<compile_context>
chip_gen: v6e
topology: v6e:2x2x1
jax: 0.10.0
libtpu: 0.0.40
codegen_flags: <defaults>
</compile_context>

<pallas_src>
import jax
import jax.numpy as jnp
from jax.experimental import pallas as pl
from jax.experimental.pallas import tpu as pltpu


_INV_SQRT2 = 0.7071067811865475


def _gelu(x):
    # exact (erf) GELU, matching torch.nn.GELU(approximate='none')
    # TODO(synk): on v5e a tanh-approx GELU (single EUP op) is cheaper if model fidelity allows.
    return 0.5 * x * (1.0 + jax.lax.erf(x * _INV_SQRT2))


def _pick_row_tile(rows, max_rows=2048):
    """Largest divisor of `rows` <= max_rows that is a multiple of 8 (sublane) or the full extent."""
    best = None
    for d in range(1, min(rows, max_rows) + 1):
        if rows % d:
            continue
        if d % 8 == 0 or d == rows:
            best = d
    # TODO(synk): for awkward row counts pad to a multiple of 8 instead of falling back to one tile.
    return rows if best is None else best


def _pick_divisor(n, cap):
    best = 1
    for d in range(1, min(n, cap) + 1):
        if n % d == 0:
            best = d
    return best


def _full_spec(arr):
    nd = arr.ndim
    return pl.BlockSpec(arr.shape, lambda i, _nd=nd: (0,) * _nd)


def _const_weight_spec(arr):
    # constant block index across the grid -> no point double-buffering; reclaim the 2nd buffer.
    return pl.BlockSpec(arr.shape, lambda *_: (0, 0), pipeline_mode=pl.Buffered(1))


# -------------------------------------- graph operator --------------------------------------
def cheb_operator(adj):
    # DenseChebConv: edge_index = adj.nonzero(); ChebConv(sym norm, lambda_max=2, K=2):
    #   T1 operator = L_hat = L - I = -D^{-1/2} A D^{-1/2}; aggregation at edge targets -> -(norm.T).
    deg = adj.sum(axis=1)
    dinv = jnp.where(deg > 0, 1.0 / jnp.sqrt(jnp.where(deg > 0, deg, 1.0)), 0.0)
    norm = dinv[:, None] * adj * dinv[None, :]
    return -(norm.T)


# ------------------------------ lane-packing (block-expansion) helpers -----------------------
# TODO(synk): block-expanded weights are O(B^2 * H^2); for large graphs (B >~ 64) tile the node
#             axis / use a per-slab (B,B) contraction instead of expanding into lanes.
def _expand_block(w, B):
    """Per-node (Din, Dout) weight -> lane-packed block-diagonal (B*Din, B*Dout), bf16."""
    eye = jnp.eye(B, dtype=jnp.float32)
    wb = jnp.einsum("ij,dp->idjp", eye, w.astype(jnp.float32))
    return wb.reshape(B * w.shape[0], B * w.shape[1]).astype(jnp.bfloat16)


def _expand_cheb(w0, w1, l_op, B):
    """ChebConv(K=2) with the graph operator folded into the weight:
    Wc[(b_in,c),(b_out,h)] = delta(b_in,b_out)*W0[c,h] + L_hat[b_out,b_in]*W1[c,h]."""
    eye = jnp.eye(B, dtype=jnp.float32)
    wc = (jnp.einsum("ij,ch->icjh", eye, w0.astype(jnp.float32))
          + jnp.einsum("ji,ch->icjh", l_op.astype(jnp.float32), w1.astype(jnp.float32)))
    return wc.reshape(B * w0.shape[0], B * w0.shape[1]).astype(jnp.bfloat16)


def _expand_block_gates(w, B, H):
    """Per-node LSTM weight (Din, 4H) -> (B*Din, 4*B*H) with gate-major output lanes (gate, b, h)."""
    Din = w.shape[0]
    w4 = w.astype(jnp.float32).reshape(Din, 4, H)
    eye = jnp.eye(B, dtype=jnp.float32)
    wb = jnp.einsum("ij,xgh->ixgjh", eye, w4)
    return wb.reshape(B * Din, 4 * B * H).astype(jnp.bfloat16)


def _tile_bias(b, B):
    """(1, D) per-node bias -> (1, B*D) with node-major lanes (b, d)."""
    return jnp.broadcast_to(b, (B, b.shape[-1])).reshape(1, -1).astype(jnp.float32)


def _tile_bias_gates(b, B, H):
    """(1, 4H) per-node LSTM bias -> (1, 4*B*H) with gate-major lanes (gate, b, h)."""
    b4 = b.reshape(4, H)
    return jnp.broadcast_to(b4[:, None, :], (4, B, H)).reshape(1, 4 * B * H).astype(jnp.float32)


# -------------- fused dense branch: input_proj -> (ChebConv+GELU) x L -> LSTM W_ih ------------
def _make_dense_branch_kernel(num_gnn_layers):
    def kernel(*refs):
        x_ref, o_ref = refs[0], refs[-1]
        w = refs[1:-1]            # [wp, bp, (wc, bc) x L, wx, bx]

        def lin(v, w_ref, b_ref):
            return jnp.dot(v, w_ref[...], preferred_element_type=jnp.float32) + b_ref[...]

        h = _gelu(lin(x_ref[...], w[0], w[1]))                               # input_proj_dense
        for l in range(num_gnn_layers):                                      # ChebConv(K=2)+GELU
            h = _gelu(lin(h.astype(jnp.bfloat16), w[2 + 2 * l], w[3 + 2 * l]))
        # LSTM layer-0 input projection (W_ih, b_ih + b_hh) hoisted out of the recurrence
        o_ref[...] = lin(h.astype(jnp.bfloat16), w[-2], w[-1]).astype(o_ref.dtype)
    return kernel


def dense_branch_gx(xd, weights, num_gnn_layers, *, row_tile_cap=2048):
    R, Din = xd.shape
    G = weights[-2].shape[1]
    # <= 2048x512 bf16 output tiles -> ~4 MiB double-buffered: fits the default scoped VMEM on
    # v5e / v6e / v7x without touching vmem_limit_bytes.
    Rt = _pick_row_tile(R, row_tile_cap)
    return pl.pallas_call(
        _make_dense_branch_kernel(num_gnn_layers),
        out_shape=jax.ShapeDtypeStruct((R, G), jnp.bfloat16),
        grid=(R // Rt,),
        in_specs=[pl.BlockSpec((Rt, Din), lambda r: (r, 0))]
                 + [_const_weight_spec(a) for a in weights],
        out_specs=pl.BlockSpec((Rt, G), lambda r: (r, 0)),
        compiler_params=pltpu.CompilerParams(dimension_semantics=("parallel",)),
    )(xd, *weights)


# ------------------------------ LSTM recurrence (h @ W_hh only) ------------------------------
def _make_lstm_kernel(return_seq, unroll):
    def kernel(gx_ref, whh_ref, o_ref, h_sc, c_sc):
        Tc, Nt, G = gx_ref.shape
        BH = whh_ref.shape[0]
        t_chunk = pl.program_id(1)

        @pl.when(t_chunk == 0)
        def _():
            h_sc[...] = jnp.zeros_like(h_sc)
            c_sc[...] = jnp.zeros_like(c_sc)

        whh = whh_ref[...]

        def step(t, carry):
            h, c = carry
            g = gx_ref[pl.ds(t, 1)].reshape(Nt, G).astype(jnp.float32)
            g = g + jnp.dot(h.astype(jnp.bfloat16), whh, preferred_element_type=jnp.float32)
            i = jax.nn.sigmoid(g[:, 0 * BH:1 * BH])
            f = jax.nn.sigmoid(g[:, 1 * BH:2 * BH])
            gg = jnp.tanh(g[:, 2 * BH:3 * BH])
            o = jax.nn.sigmoid(g[:, 3 * BH:4 * BH])
            c = f * c + i * gg
            h = o * jnp.tanh(c)
            if return_seq:
                o_ref[pl.ds(t, 1)] = h.reshape(1, Nt, BH).astype(o_ref.dtype)
            return h, c

        h, c = jax.lax.fori_loop(0, Tc, step, (h_sc[...], c_sc[...]), unroll=unroll)
        h_sc[...] = h
        c_sc[...] = c

        if not return_seq:
            @pl.when(t_chunk == pl.num_programs(1) - 1)
            def _():
                o_ref[...] = h.astype(o_ref.dtype)
    return kernel


def lstm_recurrence(gx, whh_b, return_seq, *, seq_tile_cap=32, t_chunk_cap=64, max_unroll=8):
    # gx: (T, N, 4*B*H) precomputed gate pre-activations (W_ih hoisted); whh_b: (B*H, 4*B*H).
    T, N, G = gx.shape
    BH = whh_b.shape[0]
    Nt = _pick_row_tile(N, seq_tile_cap)     # independent sequences: "parallel" (v7x 2-TC shard)
    Tc = _pick_divisor(T, t_chunk_cap)       # chunk long sequences; h/c carried in VMEM scratch
    unroll = max(1, min(max_unroll, Tc))
    if return_seq:
        out_shape = jax.ShapeDtypeStruct((T, N, BH), jnp.bfloat16)
        out_spec = pl.BlockSpec((Tc, Nt, BH), lambda r, t: (t, r, 0))
    else:
        out_shape = jax.ShapeDtypeStruct((N, BH), jnp.float32)
        out_spec = pl.BlockSpec((Nt, BH), lambda r, t: (r, 0))
    return pl.pallas_call(
        _make_lstm_kernel(return_seq, unroll),
        out_shape=out_shape,
        grid=(N // Nt, T // Tc),
        in_specs=[pl.BlockSpec((Tc, Nt, G), lambda r, t: (t, r, 0)),
                  _const_weight_spec(whh_b)],
        out_specs=out_spec,
        scratch_shapes=[pltpu.VMEM((Nt, BH), jnp.float32),
                        pltpu.VMEM((Nt, BH), jnp.float32)],
        compiler_params=pltpu.CompilerParams(dimension_semantics=("parallel", "arbitrary")),
    )(gx, whh_b)


# ----------------- row-tiled linear (W_ih of stacked LSTM layers, hoisted) -------------------
def _linear_rows_kernel(x_ref, w_ref, b_ref, o_ref):
    o_ref[...] = (jnp.dot(x_ref[...], w_ref[...], preferred_element_type=jnp.float32)
                  + b_ref[...]).astype(o_ref.dtype)


def linear_rows(x, w, b, *, row_tile_cap=2048):
    R, Din = x.shape
    Dout = w.shape[1]
    Rt = _pick_row_tile(R, row_tile_cap)
    return pl.pallas_call(
        _linear_rows_kernel,
        out_shape=jax.ShapeDtypeStruct((R, Dout), jnp.bfloat16),
        grid=(R // Rt,),
        in_specs=[pl.BlockSpec((Rt, Din), lambda r: (r, 0)),
                  _const_weight_spec(w), _const_weight_spec(b)],
        out_specs=pl.BlockSpec((Rt, Dout), lambda r: (r, 0)),
        compiler_params=pltpu.CompilerParams(dimension_semantics=("parallel",)),
    )(x, w, b)


# ---------------------------- gate / sparse MLP / regression head ---------------------------
def _head_kernel(x_ref, s_ref,
                 wps_ref, bps_ref, ws0_ref, bs0_ref, ws1_ref, bs1_ref,
                 wg0_ref, bg0_ref, wg1_ref, bg1_ref, wr_ref, br_ref,
                 o_ref):
    x = x_ref[...]                                   # (N, H)  selected dense embedding
    s = s_ref[...]                                   # (N, Ds) selected sparse features
    H = x.shape[-1]

    def lin(v, w, b):
        return jnp.dot(v, w[...], preferred_element_type=jnp.float32) + b[...]

    # input_proj_sparse + sparse MLP (2 x Linear+GELU)
    s = _gelu(lin(s, wps_ref, bps_ref))
    s = _gelu(lin(s, ws0_ref, bs0_ref))
    s = _gelu(lin(s, ws1_ref, bs1_ref))
    # gate_dense and gate_sparse fused into one packed matmul pair (both read x)
    gates = jax.nn.sigmoid(lin(_gelu(lin(x, wg0_ref, bg0_ref)), wg1_ref, bg1_ref))   # (N, 2H)
    h = jnp.concatenate([x * gates[:, :H], s * gates[:, H:]], axis=1)                # (N, 2H)
    # inference-mode BatchNorm1d is pre-folded into (wr, br)
    o_ref[...] = lin(h, wr_ref, br_ref).astype(o_ref.dtype)


def gate_head(head_params, x_sel, s_raw):
    args = (x_sel, s_raw) + tuple(head_params)
    n = x_sel.shape[0]
    out_size = head_params[-1].shape[-1]
    return pl.pallas_call(
        _head_kernel,
        out_shape=jax.ShapeDtypeStruct((n, out_size), jnp.float32),
        grid=(1,),
        in_specs=[_full_spec(a) for a in args],
        out_specs=pl.BlockSpec((n, out_size), lambda i: (0, 0)),
        compiler_params=pltpu.CompilerParams(dimension_semantics=("arbitrary",)),
    )(*args)


# --------------------------------------- parameters -----------------------------------------
def _glorot(key, shape):
    scale = (6.0 / (shape[0] + shape[1])) ** 0.5
    return jax.random.uniform(key, shape, jnp.float32, -scale, scale)


def _torch_linear(key, n_in, n_out):
    kw, kb = jax.random.split(key)
    bound = 1.0 / (n_in ** 0.5)
    w = jax.random.uniform(kw, (n_in, n_out), jnp.float32, -bound, bound)
    b = jax.random.uniform(kb, (1, n_out), jnp.float32, -bound, bound)
    return w, b


def init_params(key, dense_size, sparse_size, output_size, proj_size=32, hidden_size=32,
                num_gnn_layers=2, num_rnn_layers=1, expansion=2):
    H, P = hidden_size, proj_size
    ki = iter(jax.random.split(key, 32))

    # input_proj_dense
    wpd, bpd = _torch_linear(next(ki), dense_size, P)
    proj_dense = (wpd.astype(jnp.bfloat16), bpd)

    # GNN layers: ChebConv(K=2) weights W0, W1 (glorot), zero bias (ChebConv default)
    gnn = []
    for l in range(num_gnn_layers):
        nin = P if l == 0 else H
        gnn.append((_glorot(next(ki), (nin, H)).astype(jnp.bfloat16),
                    _glorot(next(ki), (nin, H)).astype(jnp.bfloat16),
                    jnp.zeros((1, H), jnp.float32)))

    # LSTM layers: W_ih (nin,4H), W_hh (H,4H) (transposed from torch layout), bias = b_ih + b_hh
    rnn = []
    for l in range(num_rnn_layers):
        nin = H
        kih, khh = jax.random.split(next(ki))
        bound = 1.0 / (H ** 0.5)
        w_ih = jax.random.uniform(kih, (4 * H, nin), jnp.float32, -bound, bound)
        a = jax.random.normal(khh, (4 * H, H), jnp.float32)
        q, r = jnp.linalg.qr(a)
        q = q * jnp.sign(jnp.diagonal(r))[None, :]
        w_hh = q * (1.0 / (H ** 0.5))               # orthogonal_(gain=1/sqrt(H))
        # init_rnn_params (verbatim, element-wise): bias_hh[0]=0, bias_hh[1]=1, bias_hh[2:]=0;
        # bias_ih = 0.  (Yes, literally the single element at flat index 1 -- matching the reference.)
        b = jnp.zeros((4 * H,), jnp.float32).at[1].set(1.0).reshape(1, 4 * H)
        rnn.append((w_ih.T.astype(jnp.bfloat16), w_hh.T.astype(jnp.bfloat16), b))

    # head: input_proj_sparse, sparse MLP, fused gates, BatchNorm folded into regression
    wps, bps = _torch_linear(next(ki), sparse_size, P)
    ws0, bs0 = _torch_linear(next(ki), P, H)
    ws1, bs1 = _torch_linear(next(ki), H, H)
    wgd0, bgd0 = _torch_linear(next(ki), H, H * expansion)
    wgd1, bgd1 = _torch_linear(next(ki), H * expansion, H)
    wgs0, bgs0 = _torch_linear(next(ki), H, H * expansion)
    wgs1, bgs1 = _torch_linear(next(ki), H * expansion, H)
    E = H * expansion
    wg0 = jnp.concatenate([wgd0, wgs0], axis=1)                     # (H, 2E): x -> both gate hiddens
    bg0 = jnp.concatenate([bgd0, bgs0], axis=1)                     # (1, 2E)
    wg1 = jnp.zeros((2 * E, 2 * H), jnp.float32)
    wg1 = wg1.at[:E, :H].set(wgd1).at[E:, H:].set(wgs1)             # block-diagonal second gate layer
    bg1 = jnp.concatenate([bgd1, bgs1], axis=1)                     # (1, 2H)
    # BatchNorm1d in inference mode (running mean=0, var=1), folded into the regression layer.
    # TODO(synk): train-mode batch statistics are not computed in-kernel.
    eps = 1e-5
    bn_scale = jnp.full((2 * H,), 1.0 / (1.0 + eps) ** 0.5, jnp.float32)
    bn_shift = jnp.zeros((1, 2 * H), jnp.float32)
    wr, br = _torch_linear(next(ki), 2 * H, output_size)
    wr_f = bn_scale[:, None] * wr
    br_f = br + bn_shift @ wr
    head = (wps, bps, ws0, bs0, ws1, bs1, wg0, bg0, wg1, bg1, wr_f, br_f)

    return {"proj_dense": proj_dense, "gnn": gnn, "rnn": rnn, "head": head}


# ----------------------------------------- forward ------------------------------------------
def graph_recur_net_gate_forward(params, inp, adj, basin_idx):
    N, T, B, D = inp.shape
    wp, bp = params["proj_dense"]
    dense_size = wp.shape[0]
    H = params["gnn"][0][0].shape[1]

    # rows = (t, n), lanes = (node b, feature): hoist the (N,T)->(T,N) relayout onto the raw
    # (narrowest) input; every later stage is then already time-major AND lane-dense.
    xd = inp[..., :dense_size]
    xd = jnp.transpose(xd, (1, 0, 2, 3)).reshape(T * N, B * dense_size).astype(jnp.bfloat16)

    # block-expanded (per-node -> lane-packed) weights; sizes are independent of the row count.
    l_op = cheb_operator(adj)
    weights = [_expand_block(wp, B), _tile_bias(bp, B)]
    for (w0, w1, b) in params["gnn"]:
        weights += [_expand_cheb(w0, w1, l_op, B), _tile_bias(b, B)]
    w_ih0, _, b0 = params["rnn"][0]
    weights += [_expand_block_gates(w_ih0, B, H), _tile_bias_gates(b0, B, H)]

    # fused: input_proj_dense -> (ChebConv(K=2)+GELU) x L -> LSTM W_ih   (one HBM round trip)
    gx = dense_branch_gx(xd, weights, num_gnn_layers=len(params["gnn"]))   # (T*N, 4*B*H) bf16
    gx = gx.reshape(T, N, 4 * B * H)

    # LSTM recurrence(s); only the last layer's final hidden state is materialized.
    n_rnn = len(params["rnn"])
    seq = None
    h_last = None
    for l, (w_ih, w_hh, b) in enumerate(params["rnn"]):
        if l > 0:  # hoisted input projection for stacked layers
            gx = linear_rows(seq.reshape(T * N, B * H),
                             _expand_block_gates(w_ih, B, H),
                             _tile_bias_gates(b, B, H)).reshape(T, N, 4 * B * H)
        whh_b = _expand_block_gates(w_hh, B, H)
        if l == n_rnn - 1:
            h_last = lstm_recurrence(gx, whh_b, return_seq=False)          # (N, B*H) f32
        else:
            seq = lstm_recurrence(gx, whh_b, return_seq=True)              # (T, N, B*H) bf16

    # per-basin selection (last timestep, node basin_idx[i])
    x_sel = h_last.reshape(N, B, H)[jnp.arange(N), basin_idx]              # (N, H)
    s_last = inp[:, T - 1, :, dense_size:]                                 # (N, B, Ds)
    s_raw = s_last[jnp.arange(N), basin_idx]                               # (N, Ds)

    # sparse branch + gating + folded BatchNorm + regression (single fused kernel)
    return gate_head(params["head"], x_sel, s_raw)


# ------------------------------- pure-JAX reference (f32) -----------------------------------
def forward_reference(params, inp, adj, basin_idx):
    N, T, B, D = inp.shape
    wp, bp = params["proj_dense"]
    dense_size = wp.shape[0]
    f32 = lambda a: a.astype(jnp.float32)

    x = inp[..., :dense_size].astype(jnp.bfloat16).astype(jnp.float32)     # share input rounding
    x = _gelu(x @ f32(wp) + bp)                                            # (N, T, B, P)
    l_op = cheb_operator(adj)
    for (w0, w1, b) in params["gnn"]:
        tx = jnp.einsum("ij,ntjc->ntic", l_op, x)
        x = _gelu(x @ f32(w0) + tx @ f32(w1) + b)

    H = x.shape[-1]
    xt = jnp.transpose(x, (1, 0, 2, 3)).reshape(T, N * B, H)
    for (w_ih, w_hh, b) in params["rnn"]:
        h = jnp.zeros((N * B, H), jnp.float32)
        c = jnp.zeros((N * B, H), jnp.float32)
        outs = []
        for t in range(T):
            g = xt[t] @ f32(w_ih) + h @ f32(w_hh) + b
            i = jax.nn.sigmoid(g[:, :H])
            f = jax.nn.sigmoid(g[:, H:2 * H])
            gg = jnp.tanh(g[:, 2 * H:3 * H])
            o = jax.nn.sigmoid(g[:, 3 * H:])
            c = f * c + i * gg
            h = o * jnp.tanh(c)
            outs.append(h)
        xt = jnp.stack(outs, axis=0)

    last = xt[T - 1].reshape(N, B, H)
    x_sel = last[jnp.arange(N), basin_idx]
    s = inp[:, T - 1, :, dense_size:][jnp.arange(N), basin_idx]

    (wps, bps, ws0, bs0, ws1, bs1, wg0, bg0, wg1, bg1, wr, br) = params["head"]
    s = _gelu(s @ wps + bps)
    s = _gelu(s @ ws0 + bs0)
    s = _gelu(s @ ws1 + bs1)
    gates = jax.nn.sigmoid(_gelu(x_sel @ wg0 + bg0) @ wg1 + bg1)
    h = jnp.concatenate([x_sel * gates[:, :H], s * gates[:, H:]], axis=1)
    return h @ wr + br


if __name__ == "__main__":
    N, T, B = 2, 8, 4
    dense_size, sparse_size = 12, 4
    proj_size, hidden_size, output_size = 32, 32, 4
    D = dense_size + sparse_size

    key = jax.random.PRNGKey(0)
    kx, kp = jax.random.split(key)
    inp = jax.random.normal(kx, (N, T, B, D), jnp.float32)

    # symmetric ring graph, zero diagonal (DenseChebConv derives edges from adj nonzeros)
    idx = jnp.arange(B)
    adj = jnp.zeros((B, B), jnp.float32).at[idx, (idx + 1) % B].set(1.0)
    adj = jnp.maximum(adj, adj.T)
    basin_idx = jnp.array([1, 3], dtype=jnp.int32)

    params = init_params(kp, dense_size, sparse_size, output_size,
                         proj_size=proj_size, hidden_size=hidden_size,
                         num_gnn_layers=2, num_rnn_layers=1, expansion=2)

    fwd = jax.jit(graph_recur_net_gate_forward)
    out = fwd(params, inp, adj, basin_idx)
    jax.block_until_ready(out)
    assert out.shape == (N, output_size) and out.dtype == jnp.float32
    assert bool(jnp.isfinite(out).all())

    ref = forward_reference(params, inp, adj, basin_idx)
    assert bool(jnp.allclose(out, ref, rtol=5e-2, atol=5e-2)), (out, ref)
    print("KERNEL_OK")
</pallas_src>

<mosaic_0001>
module attributes {stable_mosaic.version = 11 : i64} {
  func.func @kernel(%arg0: i32, %arg1: memref<16x48xbf16, #tpu.memory_space<vmem>>, %arg2: memref<48x128xbf16, #tpu.memory_space<vmem>>, %arg3: memref<1x128xf32, #tpu.memory_space<vmem>>, %arg4: memref<128x128xbf16, #tpu.memory_space<vmem>>, %arg5: memref<1x128xf32, #tpu.memory_space<vmem>>, %arg6: memref<128x128xbf16, #tpu.memory_space<vmem>>, %arg7: memref<1x128xf32, #tpu.memory_space<vmem>>, %arg8: memref<128x512xbf16, #tpu.memory_space<vmem>>, %arg9: memref<1x512xf32, #tpu.memory_space<vmem>>, %arg10: memref<16x512xbf16, #tpu.memory_space<vmem>>) attributes {dimension_semantics = [#tpu.dimension_semantics<parallel>], iteration_bounds = array<i64: 1>, scalar_prefetch = 0 : i64, scratch_operands = 0 : i64, tpu.core_type = #tpu.core_type<tc>, window_params = [{transform_indices = @transform_0, window_bounds = array<i64: 16, 48>}, {pipeline_mode = #tpu.pipeline_mode<synchronous>, transform_indices = @transform_1, window_bounds = array<i64: 48, 128>}, {pipeline_mode = #tpu.pipeline_mode<synchronous>, transform_indices = @transform_2, window_bounds = array<i64: 1, 128>}, {pipeline_mode = #tpu.pipeline_mode<synchronous>, transform_indices = @transform_3, window_bounds = array<i64: 128, 128>}, {pipeline_mode = #tpu.pipeline_mode<synchronous>, transform_indices = @transform_4, window_bounds = array<i64: 1, 128>}, {pipeline_mode = #tpu.pipeline_mode<synchronous>, transform_indices = @transform_5, window_bounds = array<i64: 128, 128>}, {pipeline_mode = #tpu.pipeline_mode<synchronous>, transform_indices = @transform_6, window_bounds = array<i64: 1, 128>}, {pipeline_mode = #tpu.pipeline_mode<synchronous>, transform_indices = @transform_7, window_bounds = array<i64: 128, 512>}, {pipeline_mode = #tpu.pipeline_mode<synchronous>, transform_indices = @transform_8, window_bounds = array<i64: 1, 512>}, {transform_indices = @transform_9, window_bounds = array<i64: 16, 512>}]} {
    %c0 = arith.constant 0 : index
    %c0_0 = arith.constant 0 : index
    %0 = vector.load %arg1[%c0, %c0_0] : memref<16x48xbf16, #tpu.memory_space<vmem>>, vector<16x48xbf16>
    %c0_1 = arith.constant 0 : index
    %c0_2 = arith.constant 0 : index
    %1 = vector.load %arg2[%c0_1, %c0_2] : memref<48x128xbf16, #tpu.memory_space<vmem>>, vector<48x128xbf16>
    %cst = arith.constant dense<0.000000e+00> : vector<16x128xf32>
    %2 = tpu.matmul %0, %1, %cst {dimension_numbers = #tpu.dot_dimension_numbers<[1], [0], [0], [1], [0, 0, 1, 1], [], []>} : vector<16x48xbf16>, vector<48x128xbf16>, vector<16x128xf32> -> vector<16x128xf32>
    %c0_3 = arith.constant 0 : index
    %c0_4 = arith.constant 0 : index
    %3 = vector.load %arg3[%c0_3, %c0_4] : memref<1x128xf32, #tpu.memory_space<vmem>>, vector<1x128xf32>
    %4 = vector.broadcast %3 : vector<1x128xf32> to vector<16x128xf32>
    %5 = arith.addf %2, %4 : vector<16x128xf32>
    %cst_5 = arith.constant 5.000000e-01 : f32
    %6 = vector.broadcast %cst_5 : f32 to vector<16x128xf32>
    %7 = arith.mulf %6, %5 : vector<16x128xf32>
    %cst_6 = arith.constant 0.707106769 : f32
    %8 = vector.broadcast %cst_6 : f32 to vector<16x128xf32>
    %9 = arith.mulf %5, %8 : vector<16x128xf32>
    %10 = math.erf %9 : vector<16x128xf32>
    %cst_7 = arith.constant 1.000000e+00 : f32
    %11 = vector.broadcast %cst_7 : f32 to vector<16x128xf32>
    %12 = arith.addf %11, %10 : vector<16x128xf32>
    %13 = arith.mulf %7, %12 : vector<16x128xf32>
    %14 = arith.truncf %13 : vector<16x128xf32> to vector<16x128xbf16>
    %c0_8 = arith.constant 0 : index
    %c0_9 = arith.constant 0 : index
    %15 = vector.load %arg4[%c0_8, %c0_9] : memref<128x128xbf16, #tpu.memory_space<vmem>>, vector<128x128xbf16>
    %cst_10 = arith.constant dense<0.000000e+00> : vector<16x128xf32>
    %16 = tpu.matmul %14, %15, %cst_10 {dimension_numbers = #tpu.dot_dimension_numbers<[1], [0], [0], [1], [0, 0, 1, 1], [], []>} : vector<16x128xbf16>, vector<128x128xbf16>, vector<16x128xf32> -> vector<16x128xf32>
    %c0_11 = arith.constant 0 : index
    %c0_12 = arith.constant 0 : index
    %17 = vector.load %arg5[%c0_11, %c0_12] : memref<1x128xf32, #tpu.memory_space<vmem>>, vector<1x128xf32>
    %18 = vector.broadcast %17 : vector<1x128xf32> to vector<16x128xf32>
    %19 = arith.addf %16, %18 : vector<16x128xf32>
    %cst_13 = arith.constant 5.000000e-01 : f32
    %20 = vector.broadcast %cst_13 : f32 to vector<16x128xf32>
    %21 = arith.mulf %20, %19 : vector<16x128xf32>
    %cst_14 = arith.constant 0.707106769 : f32
    %22 = vector.broadcast %cst_14 : f32 to vector<16x128xf32>
    %23 = arith.mulf %19, %22 : vector<16x128xf32>
    %24 = math.erf %23 : vector<16x128xf32>
    %cst_15 = arith.constant 1.000000e+00 : f32
    %25 = vector.broadcast %cst_15 : f32 to vector<16x128xf32>
    %26 = arith.addf %25, %24 : vector<16x128xf32>
    %27 = arith.mulf %21, %26 : vector<16x128xf32>
    %28 = arith.truncf %27 : vector<16x128xf32> to vector<16x128xbf16>
    %c0_16 = arith.constant 0 : index
    %c0_17 = arith.constant 0 : index
    %29 = vector.load %arg6[%c0_16, %c0_17] : memref<128x128xbf16, #tpu.memory_space<vmem>>, vector<128x128xbf16>
    %cst_18 = arith.constant dense<0.000000e+00> : vector<16x128xf32>
    %30 = tpu.matmul %28, %29, %cst_18 {dimension_numbers = #tpu.dot_dimension_numbers<[1], [0], [0], [1], [0, 0, 1, 1], [], []>} : vector<16x128xbf16>, vector<128x128xbf16>, vector<16x128xf32> -> vector<16x128xf32>
    %c0_19 = arith.constant 0 : index
    %c0_20 = arith.constant 0 : index
    %31 = vector.load %arg7[%c0_19, %c0_20] : memref<1x128xf32, #tpu.memory_space<vmem>>, vector<1x128xf32>
    %32 = vector.broadcast %31 : vector<1x128xf32> to vector<16x128xf32>
    %33 = arith.addf %30, %32 : vector<16x128xf32>
    %cst_21 = arith.constant 5.000000e-01 : f32
    %34 = vector.broadcast %cst_21 : f32 to vector<16x128xf32>
    %35 = arith.mulf %34, %33 : vector<16x128xf32>
    %cst_22 = arith.constant 0.707106769 : f32
    %36 = vector.broadcast %cst_22 : f32 to vector<16x128xf32>
    %37 = arith.mulf %33, %36 : vector<16x128xf32>
    %38 = math.erf %37 : vector<16x128xf32>
    %cst_23 = arith.constant 1.000000e+00 : f32
    %39 = vector.broadcast %cst_23 : f32 to vector<16x128xf32>
    %40 = arith.addf %39, %38 : vector<16x128xf32>
    %41 = arith.mulf %35, %40 : vector<16x128xf32>
    %42 = arith.truncf %41 : vector<16x128xf32> to vector<16x128xbf16>
    %c0_24 = arith.constant 0 : index
    %c0_25 = arith.constant 0 : index
    %43 = vector.load %arg8[%c0_24, %c0_25] : memref<128x512xbf16, #tpu.memory_space<vmem>>, vector<128x512xbf16>
    %cst_26 = arith.constant dense<0.000000e+00> : vector<16x512xf32>
    %44 = tpu.matmul %42, %43, %cst_26 {dimension_numbers = #tpu.dot_dimension_numbers<[1], [0], [0], [1], [0, 0, 1, 1], [], []>} : vector<16x128xbf16>, vector<128x512xbf16>, vector<16x512xf32> -> vector<16x512xf32>
    %c0_27 = arith.constant 0 : index
    %c0_28 = arith.constant 0 : index
    %45 = vector.load %arg9[%c0_27, %c0_28] : memref<1x512xf32, #tpu.memory_space<vmem>>, vector<1x512xf32>
    %46 = vector.broadcast %45 : vector<1x512xf32> to vector<16x512xf32>
    %47 = arith.addf %44, %46 : vector<16x512xf32>
    %48 = arith.truncf %47 : vector<16x512xf32> to vector<16x512xbf16>
    %c0_29 = arith.constant 0 : index
    %c0_30 = arith.constant 0 : index
    %49 = vector.load %arg10[%c0_29, %c0_30] : memref<16x512xbf16, #tpu.memory_space<vmem>>, vector<16x512xbf16>
    tpu.vector_store %arg10[%c0_29, %c0_30], %48 {strides = array<i32>} : memref<16x512xbf16, #tpu.memory_space<vmem>>, vector<16x512xbf16>,
    return
  }
  func.func @transform_0(%arg0: i32) -> (i32, i32) {
    %c0_i32 = arith.constant 0 : i32
    %c0_i32_0 = arith.constant 0 : i32
    return %arg0, %c0_i32 : i32, i32
  }
  func.func @transform_1(%arg0: i32) -> (i32, i32) {
    %c0_i32 = arith.constant 0 : i32
    %c0_i32_0 = arith.constant 0 : i32
    %c0_i32_1 = arith.constant 0 : i32
    return %c0_i32, %c0_i32_0 : i32, i32
  }
  func.func @transform_2(%arg0: i32) -> (i32, i32) {
    %c0_i32 = arith.constant 0 : i32
    %c0_i32_0 = arith.constant 0 : i32
    %c0_i32_1 = arith.constant 0 : i32
    return %c0_i32, %c0_i32_0 : i32, i32
  }
  func.func @transform_3(%arg0: i32) -> (i32, i32) {
    %c0_i32 = arith.constant 0 : i32
    %c0_i32_0 = arith.constant 0 : i32
    %c0_i32_1 = arith.constant 0 : i32
    return %c0_i32, %c0_i32_0 : i32, i32
  }
  func.func @transform_4(%arg0: i32) -> (i32, i32) {
    %c0_i32 = arith.constant 0 : i32
    %c0_i32_0 = arith.constant 0 : i32
    %c0_i32_1 = arith.constant 0 : i32
    return %c0_i32, %c0_i32_0 : i32, i32
  }
  func.func @transform_5(%arg0: i32) -> (i32, i32) {
    %c0_i32 = arith.constant 0 : i32
    %c0_i32_0 = arith.constant 0 : i32
    %c0_i32_1 = arith.constant 0 : i32
    return %c0_i32, %c0_i32_0 : i32, i32
  }
  func.func @transform_6(%arg0: i32) -> (i32, i32) {
    %c0_i32 = arith.constant 0 : i32
    %c0_i32_0 = arith.constant 0 : i32
    %c0_i32_1 = arith.constant 0 : i32
    return %c0_i32, %c0_i32_0 : i32, i32
  }
  func.func @transform_7(%arg0: i32) -> (i32, i32) {
    %c0_i32 = arith.constant 0 : i32
    %c0_i32_0 = arith.constant 0 : i32
    %c0_i32_1 = arith.constant 0 : i32
    return %c0_i32, %c0_i32_0 : i32, i32
  }
  func.func @transform_8(%arg0: i32) -> (i32, i32) {
    %c0_i32 = arith.constant 0 : i32
    %c0_i32_0 = arith.constant 0 : i32
    %c0_i32_1 = arith.constant 0 : i32
    return %c0_i32, %c0_i32_0 : i32, i32
  }
  func.func @transform_9(%arg0: i32) -> (i32, i32) {
    %c0_i32 = arith.constant 0 : i32
    %c0_i32_0 = arith.constant 0 : i32
    return %arg0, %c0_i32 : i32, i32
  }
}

module attributes {stable_mosaic.version = 11 : i64} {
  func.func @kernel(%arg0: i32, %arg1: i32, %arg2: memref<8x2x512xbf16, #tpu.memory_space<vmem>>, %arg3: memref<128x512xbf16, #tpu.memory_space<vmem>>, %arg4: memref<2x128xf32, #tpu.memory_space<vmem>>, %arg5: memref<2x128xf32, #tpu.memory_space<vmem>>, %arg6: memref<2x128xf32, #tpu.memory_space<vmem>>) attributes {dimension_semantics = [#tpu.dimension_semantics<parallel>, #tpu.dimension_semantics<arbitrary>], iteration_bounds = array<i64: 1, 1>, scalar_prefetch = 0 : i64, scratch_operands = 2 : i64, tpu.core_type = #tpu.core_type<tc>, window_params = [{transform_indices = @transform_0, window_bounds = array<i64: 8, 2, 512>}, {pipeline_mode = #tpu.pipeline_mode<synchronous>, transform_indices = @transform_1, window_bounds = array<i64: 128, 512>}, {transform_indices = @transform_2, window_bounds = array<i64: 2, 128>}]} {
    %c0_i32 = arith.constant 0 : i32
    %0 = arith.cmpi eq, %arg1, %c0_i32 : i32
    %1 = arith.extui %0 : i1 to i32
    %c0_i32_0 = arith.constant 0 : i32
    %2 = arith.cmpi ne, %1, %c0_i32_0 : i32
    scf.if %2 {
      %cst_60 = arith.constant 0.000000e+00 : f32
      %267 = vector.broadcast %cst_60 : f32 to vector<2x128xf32>
      %c0_61 = arith.constant 0 : index
      %c0_62 = arith.constant 0 : index
      %268 = vector.load %arg5[%c0_61, %c0_62] : memref<2x128xf32, #tpu.memory_space<vmem>>, vector<2x128xf32>
      tpu.vector_store %arg5[%c0_61, %c0_62], %267 {strides = array<i32>} : memref<2x128xf32, #tpu.memory_space<vmem>>, vector<2x128xf32>,
      %cst_63 = arith.constant 0.000000e+00 : f32
      %269 = vector.broadcast %cst_63 : f32 to vector<2x128xf32>
      %c0_64 = arith.constant 0 : index
      %c0_65 = arith.constant 0 : index
      %270 = vector.load %arg6[%c0_64, %c0_65] : memref<2x128xf32, #tpu.memory_space<vmem>>, vector<2x128xf32>
      tpu.vector_store %arg6[%c0_64, %c0_65], %269 {strides = array<i32>} : memref<2x128xf32, #tpu.memory_space<vmem>>, vector<2x128xf32>,
    } else {
    }
    %c0 = arith.constant 0 : index
    %c0_1 = arith.constant 0 : index
    %3 = vector.load %arg3[%c0, %c0_1] : memref<128x512xbf16, #tpu.memory_space<vmem>>, vector<128x512xbf16>
    %c0_2 = arith.constant 0 : index
    %c0_3 = arith.constant 0 : index
    %4 = vector.load %arg5[%c0_2, %c0_3] : memref<2x128xf32, #tpu.memory_space<vmem>>, vector<2x128xf32>
    %c0_4 = arith.constant 0 : index
    %c0_5 = arith.constant 0 : index
    %5 = vector.load %arg6[%c0_4, %c0_5] : memref<2x128xf32, #tpu.memory_space<vmem>>, vector<2x128xf32>
    %c0_i32_6 = arith.constant 0 : i32
    %6 = arith.index_cast %c0_i32_6 : i32 to index
    %c0_7 = arith.constant 0 : index
    %c0_8 = arith.constant 0 : index
    %7 = vector.load %arg2[%6, %c0_7, %c0_8] : memref<8x2x512xbf16, #tpu.memory_space<vmem>>, vector<1x2x512xbf16>
    %8 = vector.shape_cast %7 : vector<1x2x512xbf16> to vector<2x512xbf16>
    %9 = arith.extf %8 : vector<2x512xbf16> to vector<2x512xf32>
    %10 = arith.truncf %4 : vector<2x128xf32> to vector<2x128xbf16>
    %cst = arith.constant dense<0.000000e+00> : vector<2x512xf32>
    %11 = tpu.matmul %10, %3, %cst {dimension_numbers = #tpu.dot_dimension_numbers<[1], [0], [0], [1], [0, 0, 1, 1], [], []>} : vector<2x128xbf16>, vector<128x512xbf16>, vector<2x512xf32> -> vector<2x512xf32>
    %12 = arith.addf %9, %11 : vector<2x512xf32>
    %13 = vector.extract_strided_slice %12 {offsets = [0, 0], sizes = [2, 128], strides = [1, 1]} : vector<2x512xf32> to vector<2x128xf32>
    %14 = arith.negf %13 : vector<2x128xf32>
    %15 = math.exp %14 : vector<2x128xf32>
    %cst_9 = arith.constant 1.000000e+00 : f32
    %16 = vector.broadcast %cst_9 : f32 to vector<2x128xf32>
    %17 = arith.addf %16, %15 : vector<2x128xf32>
    %18 = arith.divf %16, %17 : vector<2x128xf32>
    %19 = vector.extract_strided_slice %12 {offsets = [0, 128], sizes = [2, 128], strides = [1, 1]} : vector<2x512xf32> to vector<2x128xf32>
    %20 = arith.negf %19 : vector<2x128xf32>
    %21 = math.exp %20 : vector<2x128xf32>
    %cst_10 = arith.constant 1.000000e+00 : f32
    %22 = vector.broadcast %cst_10 : f32 to vector<2x128xf32>
    %23 = arith.addf %22, %21 : vector<2x128xf32>
    %24 = arith.divf %22, %23 : vector<2x128xf32>
    %25 = vector.extract_strided_slice %12 {offsets = [0, 256], sizes = [2, 128], strides = [1, 1]} : vector<2x512xf32> to vector<2x128xf32>
    %26 = math.tanh %25 : vector<2x128xf32>
    %27 = vector.extract_strided_slice %12 {offsets = [0, 384], sizes = [2, 128], strides = [1, 1]} : vector<2x512xf32> to vector<2x128xf32>
    %28 = arith.negf %27 : vector<2x128xf32>
    %29 = math.exp %28 : vector<2x128xf32>
    %cst_11 = arith.constant 1.000000e+00 : f32
    %30 = vector.broadcast %cst_11 : f32 to vector<2x128xf32>
    %31 = arith.addf %30, %29 : vector<2x128xf32>
    %32 = arith.divf %30, %31 : vector<2x128xf32>
    %33 = arith.mulf %24, %5 : vector<2x128xf32>
    %34 = arith.mulf %18, %26 : vector<2x128xf32>
    %35 = arith.addf %33, %34 : vector<2x128xf32>
    %36 = math.tanh %35 : vector<2x128xf32>
    %37 = arith.mulf %32, %36 : vector<2x128xf32>
    %c1_i32 = arith.constant 1 : i32
    %38 = arith.index_cast %c1_i32 : i32 to index
    %c0_12 = arith.constant 0 : index
    %c0_13 = arith.constant 0 : index
    %39 = vector.load %arg2[%38, %c0_12, %c0_13] : memref<8x2x512xbf16, #tpu.memory_space<vmem>>, vector<1x2x512xbf16>
    %40 = vector.shape_cast %39 : vector<1x2x512xbf16> to vector<2x512xbf16>
    %41 = arith.extf %40 : vector<2x512xbf16> to vector<2x512xf32>
    %42 = arith.truncf %37 : vector<2x128xf32> to vector<2x128xbf16>
    %cst_14 = arith.constant dense<0.000000e+00> : vector<2x512xf32>
    %43 = tpu.matmul %42, %3, %cst_14 {dimension_numbers = #tpu.dot_dimension_numbers<[1], [0], [0], [1], [0, 0, 1, 1], [], []>} : vector<2x128xbf16>, vector<128x512xbf16>, vector<2x512xf32> -> vector<2x512xf32>
    %44 = arith.addf %41, %43 : vector<2x512xf32>
    %45 = vector.extract_strided_slice %44 {offsets = [0, 0], sizes = [2, 128], strides = [1, 1]} : vector<2x512xf32> to vector<2x128xf32>
    %46 = arith.negf %45 : vector<2x128xf32>
    %47 = math.exp %46 : vector<2x128xf32>
    %cst_15 = arith.constant 1.000000e+00 : f32
    %48 = vector.broadcast %cst_15 : f32 to vector<2x128xf32>
    %49 = arith.addf %48, %47 : vector<2x128xf32>
    %50 = arith.divf %48, %49 : vector<2x128xf32>
    %51 = vector.extract_strided_slice %44 {offsets = [0, 128], sizes = [2, 128], strides = [1, 1]} : vector<2x512xf32> to vector<2x128xf32>
    %52 = arith.negf %51 : vector<2x128xf32>
    %53 = math.exp %52 : vector<2x128xf32>
    %cst_16 = arith.constant 1.000000e+00 : f32
    %54 = vector.broadcast %cst_16 : f32 to vector<2x128xf32>
    %55 = arith.addf %54, %53 : vector<2x128xf32>
    %56 = arith.divf %54, %55 : vector<2x128xf32>
    %57 = vector.extract_strided_slice %44 {offsets = [0, 256], sizes = [2, 128], strides = [1, 1]} : vector<2x512xf32> to vector<2x128xf32>
    %58 = math.tanh %57 : vector<2x128xf32>
    %59 = vector.extract_strided_slice %44 {offsets = [0, 384], sizes = [2, 128], strides = [1, 1]} : vector<2x512xf32> to vector<2x128xf32>
    %60 = arith.negf %59 : vector<2x128xf32>
    %61 = math.exp %60 : vector<2x128xf32>
    %cst_17 = arith.constant 1.000000e+00 : f32
    %62 = vector.broadcast %cst_17 : f32 to vector<2x128xf32>
    %63 = arith.addf %62, %61 : vector<2x128xf32>
    %64 = arith.divf %62, %63 : vector<2x128xf32>
    %65 = arith.mulf %56, %35 : vector<2x128xf32>
    %66 = arith.mulf %50, %58 : vector<2x128xf32>
    %67 = arith.addf %65, %66 : vector<2x128xf32>
    %68 = math.tanh %67 : vector<2x128xf32>
    %69 = arith.mulf %64, %68 : vector<2x128xf32>
    %c2_i32 = arith.constant 2 : i32
    %70 = arith.index_cast %c2_i32 : i32 to index
    %c0_18 = arith.constant 0 : index
    %c0_19 = arith.constant 0 : index
    %71 = vector.load %arg2[%70, %c0_18, %c0_19] : memref<8x2x512xbf16, #tpu.memory_space<vmem>>, vector<1x2x512xbf16>
    %72 = vector.shape_cast %71 : vector<1x2x512xbf16> to vector<2x512xbf16>
    %73 = arith.extf %72 : vector<2x512xbf16> to vector<2x512xf32>
    %74 = arith.truncf %69 : vector<2x128xf32> to vector<2x128xbf16>
    %cst_20 = arith.constant dense<0.000000e+00> : vector<2x512xf32>
    %75 = tpu.matmul %74, %3, %cst_20 {dimension_numbers = #tpu.dot_dimension_numbers<[1], [0], [0], [1], [0, 0, 1, 1], [], []>} : vector<2x128xbf16>, vector<128x512xbf16>, vector<2x512xf32> -> vector<2x512xf32>
    %76 = arith.addf %73, %75 : vector<2x512xf32>
    %77 = vector.extract_strided_slice %76 {offsets = [0, 0], sizes = [2, 128], strides = [1, 1]} : vector<2x512xf32> to vector<2x128xf32>
    %78 = arith.negf %77 : vector<2x128xf32>
    %79 = math.exp %78 : vector<2x128xf32>
    %cst_21 = arith.constant 1.000000e+00 : f32
    %80 = vector.broadcast %cst_21 : f32 to vector<2x128xf32>
    %81 = arith.addf %80, %79 : vector<2x128xf32>
    %82 = arith.divf %80, %81 : vector<2x128xf32>
    %83 = vector.extract_strided_slice %76 {offsets = [0, 128], sizes = [2, 128], strides = [1, 1]} : vector<2x512xf32> to vector<2x128xf32>
    %84 = arith.negf %83 : vector<2x128xf32>
    %85 = math.exp %84 : vector<2x128xf32>
    %cst_22 = arith.constant 1.000000e+00 : f32
    %86 = vector.broadcast %cst_22 : f32 to vector<2x128xf32>
    %87 = arith.addf %86, %85 : vector<2x128xf32>
    %88 = arith.divf %86, %87 : vector<2x128xf32>
    %89 = vector.extract_strided_slice %76 {offsets = [0, 256], sizes = [2, 128], strides = [1, 1]} : vector<2x512xf32> to vector<2x128xf32>
    %90 = math.tanh %89 : vector<2x128xf32>
    %91 = vector.extract_strided_slice %76 {offsets = [0, 384], sizes = [2, 128], strides = [1, 1]} : vector<2x512xf32> to vector<2x128xf32>
    %92 = arith.negf %91 : vector<2x128xf32>
    %93 = math.exp %92 : vector<2x128xf32>
    %cst_23 = arith.constant 1.000000e+00 : f32
    %94 = vector.broadcast %cst_23 : f32 to vector<2x128xf32>
    %95 = arith.addf %94, %93 : vector<2x128xf32>
    %96 = arith.divf %94, %95 : vector<2x128xf32>
    %97 = arith.mulf %88, %67 : vector<2x128xf32>
    %98 = arith.mulf %82, %90 : vector<2x128xf32>
    %99 = arith.addf %97, %98 : vector<2x128xf32>
    %100 = math.tanh %99 : vector<2x128xf32>
    %101 = arith.mulf %96, %100 : vector<2x128xf32>
    %c3_i32 = arith.constant 3 : i32
    %102 = arith.index_cast %c3_i32 : i32 to index
    %c0_24 = arith.constant 0 : index
    %c0_25 = arith.constant 0 : index
    %103 = vector.load %arg2[%102, %c0_24, %c0_25] : memref<8x2x512xbf16, #tpu.memory_space<vmem>>, vector<1x2x512xbf16>
    %104 = vector.shape_cast %103 : vector<1x2x512xbf16> to vector<2x512xbf16>
    %105 = arith.extf %104 : vector<2x512xbf16> to vector<2x512xf32>
    %106 = arith.truncf %101 : vector<2x128xf32> to vector<2x128xbf16>
    %cst_26 = arith.constant dense<0.000000e+00> : vector<2x512xf32>
    %107 = tpu.matmul %106, %3, %cst_26 {dimension_numbers = #tpu.dot_dimension_numbers<[1], [0], [0], [1], [0, 0, 1, 1], [], []>} : vector<2x128xbf16>, vector<128x512xbf16>, vector<2x512xf32> -> vector<2x512xf32>
    %108 = arith.addf %105, %107 : vector<2x512xf32>
    %109 = vector.extract_strided_slice %108 {offsets = [0, 0], sizes = [2, 128], strides = [1, 1]} : vector<2x512xf32> to vector<2x128xf32>
    %110 = arith.negf %109 : vector<2x128xf32>
    %111 = math.exp %110 : vector<2x128xf32>
    %cst_27 = arith.constant 1.000000e+00 : f32
    %112 = vector.broadcast %cst_27 : f32 to vector<2x128xf32>
    %113 = arith.addf %112, %111 : vector<2x128xf32>
    %114 = arith.divf %112, %113 : vector<2x128xf32>
    %115 = vector.extract_strided_slice %108 {offsets = [0, 128], sizes = [2, 128], strides = [1, 1]} : vector<2x512xf32> to vector<2x128xf32>
    %116 = arith.negf %115 : vector<2x128xf32>
    %117 = math.exp %116 : vector<2x128xf32>
    %cst_28 = arith.constant 1.000000e+00 : f32
    %118 = vector.broadcast %cst_28 : f32 to vector<2x128xf32>
    %119 = arith.addf %118, %117 : vector<2x128xf32>
    %120 = arith.divf %118, %119 : vector<2x128xf32>
    %121 = vector.extract_strided_slice %108 {offsets = [0, 256], sizes = [2, 128], strides = [1, 1]} : vector<2x512xf32> to vector<2x128xf32>
    %122 = math.tanh %121 : vector<2x128xf32>
    %123 = vector.extract_strided_slice %108 {offsets = [0, 384], sizes = [2, 128], strides = [1, 1]} : vector<2x512xf32> to vector<2x128xf32>
    %124 = arith.negf %123 : vector<2x128xf32>
    %125 = math.exp %124 : vector<2x128xf32>
    %cst_29 = arith.constant 1.000000e+00 : f32
    %126 = vector.broadcast %cst_29 : f32 to vector<2x128xf32>
    %127 = arith.addf %126, %125 : vector<2x128xf32>
    %128 = arith.divf %126, %127 : vector<2x128xf32>
    %129 = arith.mulf %120, %99 : vector<2x128xf32>
    %130 = arith.mulf %114, %122 : vector<2x128xf32>
    %131 = arith.addf %129, %130 : vector<2x128xf32>
    %132 = math.tanh %131 : vector<2x128xf32>
    %133 = arith.mulf %128, %132 : vector<2x128xf32>
    %c4_i32 = arith.constant 4 : i32
    %134 = arith.index_cast %c4_i32 : i32 to index
    %c0_30 = arith.constant 0 : index
    %c0_31 = arith.constant 0 : index
    %135 = vector.load %arg2[%134, %c0_30, %c0_31] : memref<8x2x512xbf16, #tpu.memory_space<vmem>>, vector<1x2x512xbf16>
    %136 = vector.shape_cast %135 : vector<1x2x512xbf16> to vector<2x512xbf16>
    %137 = arith.extf %136 : vector<2x512xbf16> to vector<2x512xf32>
    %138 = arith.truncf %133 : vector<2x128xf32> to vector<2x128xbf16>
    %cst_32 = arith.constant dense<0.000000e+00> : vector<2x512xf32>
    %139 = tpu.matmul %138, %3, %cst_32 {dimension_numbers = #tpu.dot_dimension_numbers<[1], [0], [0], [1], [0, 0, 1, 1], [], []>} : vector<2x128xbf16>, vector<128x512xbf16>, vector<2x512xf32> -> vector<2x512xf32>
    %140 = arith.addf %137, %139 : vector<2x512xf32>
    %141 = vector.extract_strided_slice %140 {offsets = [0, 0], sizes = [2, 128], strides = [1, 1]} : vector<2x512xf32> to vector<2x128xf32>
    %142 = arith.negf %141 : vector<2x128xf32>
    %143 = math.exp %142 : vector<2x128xf32>
    %cst_33 = arith.constant 1.000000e+00 : f32
    %144 = vector.broadcast %cst_33 : f32 to vector<2x128xf32>
    %145 = arith.addf %144, %143 : vector<2x128xf32>
    %146 = arith.divf %144, %145 : vector<2x128xf32>
    %147 = vector.extract_strided_slice %140 {offsets = [0, 128], sizes = [2, 128], strides = [1, 1]} : vector<2x512xf32> to vector<2x128xf32>
    %148 = arith.negf %147 : vector<2x128xf32>
    %149 = math.exp %148 : vector<2x128xf32>
    %cst_34 = arith.constant 1.000000e+00 : f32
    %150 = vector.broadcast %cst_34 : f32 to vector<2x128xf32>
    %151 = arith.addf %150, %149 : vector<2x128xf32>
    %152 = arith.divf %150, %151 : vector<2x128xf32>
    %153 = vector.extract_strided_slice %140 {offsets = [0, 256], sizes = [2, 128], strides = [1, 1]} : vector<2x512xf32> to vector<2x128xf32>
    %154 = math.tanh %153 : vector<2x128xf32>
    %155 = vector.extract_strided_slice %140 {offsets = [0, 384], sizes = [2, 128], strides = [1, 1]} : vector<2x512xf32> to vector<2x128xf32>
    %156 = arith.negf %155 : vector<2x128xf32>
    %157 = math.exp %156 : vector<2x128xf32>
    %cst_35 = arith.constant 1.000000e+00 : f32
    %158 = vector.broadcast %cst_35 : f32 to vector<2x128xf32>
    %159 = arith.addf %158, %157 : vector<2x128xf32>
    %160 = arith.divf %158, %159 : vector<2x128xf32>
    %161 = arith.mulf %152, %131 : vector<2x128xf32>
    %162 = arith.mulf %146, %154 : vector<2x128xf32>
    %163 = arith.addf %161, %162 : vector<2x128xf32>
    %164 = math.tanh %163 : vector<2x128xf32>
    %165 = arith.mulf %160, %164 : vector<2x128xf32>
    %c5_i32 = arith.constant 5 : i32
    %166 = arith.index_cast %c5_i32 : i32 to index
    %c0_36 = arith.constant 0 : index
    %c0_37 = arith.constant 0 : index
    %167 = vector.load %arg2[%166, %c0_36, %c0_37] : memref<8x2x512xbf16, #tpu.memory_space<vmem>>, vector<1x2x512xbf16>
    %168 = vector.shape_cast %167 : vector<1x2x512xbf16> to vector<2x512xbf16>
    %169 = arith.extf %168 : vector<2x512xbf16> to vector<2x512xf32>
    %170 = arith.truncf %165 : vector<2x128xf32> to vector<2x128xbf16>
    %cst_38 = arith.constant dense<0.000000e+00> : vector<2x512xf32>
    %171 = tpu.matmul %170, %3, %cst_38 {dimension_numbers = #tpu.dot_dimension_numbers<[1], [0], [0], [1], [0, 0, 1, 1], [], []>} : vector<2x128xbf16>, vector<128x512xbf16>, vector<2x512xf32> -> vector<2x512xf32>
    %172 = arith.addf %169, %171 : vector<2x512xf32>
    %173 = vector.extract_strided_slice %172 {offsets = [0, 0], sizes = [2, 128], strides = [1, 1]} : vector<2x512xf32> to vector<2x128xf32>
    %174 = arith.negf %173 : vector<2x128xf32>
    %175 = math.exp %174 : vector<2x128xf32>
    %cst_39 = arith.constant 1.000000e+00 : f32
    %176 = vector.broadcast %cst_39 : f32 to vector<2x128xf32>
    %177 = arith.addf %176, %175 : vector<2x128xf32>
    %178 = arith.divf %176, %177 : vector<2x128xf32>
    %179 = vector.extract_strided_slice %172 {offsets = [0, 128], sizes = [2, 128], strides = [1, 1]} : vector<2x512xf32> to vector<2x128xf32>
    %180 = arith.negf %179 : vector<2x128xf32>
    %181 = math.exp %180 : vector<2x128xf32>
    %cst_40 = arith.constant 1.000000e+00 : f32
    %182 = vector.broadcast %cst_40 : f32 to vector<2x128xf32>
    %183 = arith.addf %182, %181 : vector<2x128xf32>
    %184 = arith.divf %182, %183 : vector<2x128xf32>
    %185 = vector.extract_strided_slice %172 {offsets = [0, 256], sizes = [2, 128], strides = [1, 1]} : vector<2x512xf32> to vector<2x128xf32>
    %186 = math.tanh %185 : vector<2x128xf32>
    %187 = vector.extract_strided_slice %172 {offsets = [0, 384], sizes = [2, 128], strides = [1, 1]} : vector<2x512xf32> to vector<2x128xf32>
    %188 = arith.negf %187 : vector<2x128xf32>
    %189 = math.exp %188 : vector<2x128xf32>
    %cst_41 = arith.constant 1.000000e+00 : f32
    %190 = vector.broadcast %cst_41 : f32 to vector<2x128xf32>
    %191 = arith.addf %190, %189 : vector<2x128xf32>
    %192 = arith.divf %190, %191 : vector<2x128xf32>
    %193 = arith.mulf %184, %163 : vector<2x128xf32>
    %194 = arith.mulf %178, %186 : vector<2x128xf32>
    %195 = arith.addf %193, %194 : vector<2x128xf32>
    %196 = math.tanh %195 : vector<2x128xf32>
    %197 = arith.mulf %192, %196 : vector<2x128xf32>
    %c6_i32 = arith.constant 6 : i32
    %198 = arith.index_cast %c6_i32 : i32 to index
    %c0_42 = arith.constant 0 : index
    %c0_43 = arith.constant 0 : index
    %199 = vector.load %arg2[%198, %c0_42, %c0_43] : memref<8x2x512xbf16, #tpu.memory_space<vmem>>, vector<1x2x512xbf16>
    %200 = vector.shape_cast %199 : vector<1x2x512xbf16> to vector<2x512xbf16>
    %201 = arith.extf %200 : vector<2x512xbf16> to vector<2x512xf32>
    %202 = arith.truncf %197 : vector<2x128xf32> to vector<2x128xbf16>
    %cst_44 = arith.constant dense<0.000000e+00> : vector<2x512xf32>
    %203 = tpu.matmul %202, %3, %cst_44 {dimension_numbers = #tpu.dot_dimension_numbers<[1], [0], [0], [1], [0, 0, 1, 1], [], []>} : vector<2x128xbf16>, vector<128x512xbf16>, vector<2x512xf32> -> vector<2x512xf32>
    %204 = arith.addf %201, %203 : vector<2x512xf32>
    %205 = vector.extract_strided_slice %204 {offsets = [0, 0], sizes = [2, 128], strides = [1, 1]} : vector<2x512xf32> to vector<2x128xf32>
    %206 = arith.negf %205 : vector<2x128xf32>
    %207 = math.exp %206 : vector<2x128xf32>
    %cst_45 = arith.constant 1.000000e+00 : f32
    %208 = vector.broadcast %cst_45 : f32 to vector<2x128xf32>
    %209 = arith.addf %208, %207 : vector<2x128xf32>
    %210 = arith.divf %208, %209 : vector<2x128xf32>
    %211 = vector.extract_strided_slice %204 {offsets = [0, 128], sizes = [2, 128], strides = [1, 1]} : vector<2x512xf32> to vector<2x128xf32>
    %212 = arith.negf %211 : vector<2x128xf32>
    %213 = math.exp %212 : vector<2x128xf32>
    %cst_46 = arith.constant 1.000000e+00 : f32
    %214 = vector.broadcast %cst_46 : f32 to vector<2x128xf32>
    %215 = arith.addf %214, %213 : vector<2x128xf32>
    %216 = arith.divf %214, %215 : vector<2x128xf32>
    %217 = vector.extract_strided_slice %204 {offsets = [0, 256], sizes = [2, 128], strides = [1, 1]} : vector<2x512xf32> to vector<2x128xf32>
    %218 = math.tanh %217 : vector<2x128xf32>
    %219 = vector.extract_strided_slice %204 {offsets = [0, 384], sizes = [2, 128], strides = [1, 1]} : vector<2x512xf32> to vector<2x128xf32>
    %220 = arith.negf %219 : vector<2x128xf32>
    %221 = math.exp %220 : vector<2x128xf32>
    %cst_47 = arith.constant 1.000000e+00 : f32
    %222 = vector.broadcast %cst_47 : f32 to vector<2x128xf32>
    %223 = arith.addf %222, %221 : vector<2x128xf32>
    %224 = arith.divf %222, %223 : vector<2x128xf32>
    %225 = arith.mulf %216, %195 : vector<2x128xf32>
    %226 = arith.mulf %210, %218 : vector<2x128xf32>
    %227 = arith.addf %225, %226 : vector<2x128xf32>
    %228 = math.tanh %227 : vector<2x128xf32>
    %229 = arith.mulf %224, %228 : vector<2x128xf32>
    %c7_i32 = arith.constant 7 : i32
    %230 = arith.index_cast %c7_i32 : i32 to index
    %c0_48 = arith.constant 0 : index
    %c0_49 = arith.constant 0 : index
    %231 = vector.load %arg2[%230, %c0_48, %c0_49] : memref<8x2x512xbf16, #tpu.memory_space<vmem>>, vector<1x2x512xbf16>
    %232 = vector.shape_cast %231 : vector<1x2x512xbf16> to vector<2x512xbf16>
    %233 = arith.extf %232 : vector<2x512xbf16> to vector<2x512xf32>
    %234 = arith.truncf %229 : vector<2x128xf32> to vector<2x128xbf16>
    %cst_50 = arith.constant dense<0.000000e+00> : vector<2x512xf32>
    %235 = tpu.matmul %234, %3, %cst_50 {dimension_numbers = #tpu.dot_dimension_numbers<[1], [0], [0], [1], [0, 0, 1, 1], [], []>} : vector<2x128xbf16>, vector<128x512xbf16>, vector<2x512xf32> -> vector<2x512xf32>
    %236 = arith.addf %233, %235 : vector<2x512xf32>
    %237 = vector.extract_strided_slice %236 {offsets = [0, 0], sizes = [2, 128], strides = [1, 1]} : vector<2x512xf32> to vector<2x128xf32>
    %238 = arith.negf %237 : vector<2x128xf32>
    %239 = math.exp %238 : vector<2x128xf32>
    %cst_51 = arith.constant 1.000000e+00 : f32
    %240 = vector.broadcast %cst_51 : f32 to vector<2x128xf32>
    %241 = arith.addf %240, %239 : vector<2x128xf32>
    %242 = arith.divf %240, %241 : vector<2x128xf32>
    %243 = vector.extract_strided_slice %236 {offsets = [0, 128], sizes = [2, 128], strides = [1, 1]} : vector<2x512xf32> to vector<2x128xf32>
    %244 = arith.negf %243 : vector<2x128xf32>
    %245 = math.exp %244 : vector<2x128xf32>
    %cst_52 = arith.constant 1.000000e+00 : f32
    %246 = vector.broadcast %cst_52 : f32 to vector<2x128xf32>
    %247 = arith.addf %246, %245 : vector<2x128xf32>
    %248 = arith.divf %246, %247 : vector<2x128xf32>
    %249 = vector.extract_strided_slice %236 {offsets = [0, 256], sizes = [2, 128], strides = [1, 1]} : vector<2x512xf32> to vector<2x128xf32>
    %250 = math.tanh %249 : vector<2x128xf32>
    %251 = vector.extract_strided_slice %236 {offsets = [0, 384], sizes = [2, 128], strides = [1, 1]} : vector<2x512xf32> to vector<2x128xf32>
    %252 = arith.negf %251 : vector<2x128xf32>
    %253 = math.exp %252 : vector<2x128xf32>
    %cst_53 = arith.constant 1.000000e+00 : f32
    %254 = vector.broadcast %cst_53 : f32 to vector<2x128xf32>
    %255 = arith.addf %254, %253 : vector<2x128xf32>
    %256 = arith.divf %254, %255 : vector<2x128xf32>
    %257 = arith.mulf %248, %227 : vector<2x128xf32>
    %258 = arith.mulf %242, %250 : vector<2x128xf32>
    %259 = arith.addf %257, %258 : vector<2x128xf32>
    %260 = math.tanh %259 : vector<2x128xf32>
    %261 = arith.mulf %256, %260 : vector<2x128xf32>
    %c8_i32 = arith.constant 8 : i32
    %c0_54 = arith.constant 0 : index
    %c0_55 = arith.constant 0 : index
    %262 = vector.load %arg5[%c0_54, %c0_55] : memref<2x128xf32, #tpu.memory_space<vmem>>, vector<2x128xf32>
    tpu.vector_store %arg5[%c0_54, %c0_55], %261 {strides = array<i32>} : memref<2x128xf32, #tpu.memory_space<vmem>>, vector<2x128xf32>,
    %c0_56 = arith.constant 0 : index
    %c0_57 = arith.constant 0 : index
    %263 = vector.load %arg6[%c0_56, %c0_57] : memref<2x128xf32, #tpu.memory_space<vmem>>, vector<2x128xf32>
    tpu.vector_store %arg6[%c0_56, %c0_57], %259 {strides = array<i32>} : memref<2x128xf32, #tpu.memory_space<vmem>>, vector<2x128xf32>,
    %c0_i32_58 = arith.constant 0 : i32
    %264 = arith.cmpi eq, %arg1, %c0_i32_58 : i32
    %265 = arith.extui %264 : i1 to i32
    %c0_i32_59 = arith.constant 0 : i32
    %266 = arith.cmpi ne, %265, %c0_i32_59 : i32
    scf.if %266 {
      %c0_60 = arith.constant 0 : index
      %c0_61 = arith.constant 0 : index
      %267 = vector.load %arg4[%c0_60, %c0_61] : memref<2x128xf32, #tpu.memory_space<vmem>>, vector<2x128xf32>
      tpu.vector_store %arg4[%c0_60, %c0_61], %261 {strides = array<i32>} : memref<2x128xf32, #tpu.memory_space<vmem>>, vector<2x128xf32>,
    } else {
    }
    return
  }
  func.func @transform_0(%arg0: i32, %arg1: i32) -> (i32, i32, i32) {
    %c0_i32 = arith.constant 0 : i32
    %c0_i32_0 = arith.constant 0 : i32
    return %arg1, %arg0, %c0_i32 : i32, i32, i32
  }
  func.func @transform_1(%arg0: i32, %arg1: i32) -> (i32, i32) {
    %c0_i32 = arith.constant 0 : i32
    %c0_i32_0 = arith.constant 0 : i32
    %c0_i32_1 = arith.constant 0 : i32
    return %c0_i32, %c0_i32_0 : i32, i32
  }
  func.func @transform_2(%arg0: i32, %arg1: i32) -> (i32, i32) {
    %c0_i32 = arith.constant 0 : i32
    %c0_i32_0 = arith.constant 0 : i32
    return %arg0, %c0_i32 : i32, i32
  }
}

module attributes {stable_mosaic.version = 11 : i64} {
  func.func @_head_kernel(%arg0: i32, %arg1: memref<2x32xf32, #tpu.memory_space<vmem>>, %arg2: memref<2x4xf32, #tpu.memory_space<vmem>>, %arg3: memref<4x32xf32, #tpu.memory_space<vmem>>, %arg4: memref<1x32xf32, #tpu.memory_space<vmem>>, %arg5: memref<32x32xf32, #tpu.memory_space<vmem>>, %arg6: memref<1x32xf32, #tpu.memory_space<vmem>>, %arg7: memref<32x32xf32, #tpu.memory_space<vmem>>, %arg8: memref<1x32xf32, #tpu.memory_space<vmem>>, %arg9: memref<32x128xf32, #tpu.memory_space<vmem>>, %arg10: memref<1x128xf32, #tpu.memory_space<vmem>>, %arg11: memref<128x64xf32, #tpu.memory_space<vmem>>, %arg12: memref<1x64xf32, #tpu.memory_space<vmem>>, %arg13: memref<64x4xf32, #tpu.memory_space<vmem>>, %arg14: memref<1x4xf32, #tpu.memory_space<vmem>>, %arg15: memref<2x4xf32, #tpu.memory_space<vmem>>) attributes {dimension_semantics = [#tpu.dimension_semantics<arbitrary>], iteration_bounds = array<i64: 1>, scalar_prefetch = 0 : i64, scratch_operands = 0 : i64, tpu.core_type = #tpu.core_type<tc>, window_params = [{pipeline_mode = #tpu.pipeline_mode<synchronous>, transform_indices = @transform_0, window_bounds = array<i64: 2, 32>}, {pipeline_mode = #tpu.pipeline_mode<synchronous>, transform_indices = @transform_1, window_bounds = array<i64: 2, 4>}, {pipeline_mode = #tpu.pipeline_mode<synchronous>, transform_indices = @transform_2, window_bounds = array<i64: 4, 32>}, {pipeline_mode = #tpu.pipeline_mode<synchronous>, transform_indices = @transform_3, window_bounds = array<i64: 1, 32>}, {pipeline_mode = #tpu.pipeline_mode<synchronous>, transform_indices = @transform_4, window_bounds = array<i64: 32, 32>}, {pipeline_mode = #tpu.pipeline_mode<synchronous>, transform_indices = @transform_5, window_bounds = array<i64: 1, 32>}, {pipeline_mode = #tpu.pipeline_mode<synchronous>, transform_indices = @transform_6, window_bounds = array<i64: 32, 32>}, {pipeline_mode = #tpu.pipeline_mode<synchronous>, transform_indices = @transform_7, window_bounds = array<i64: 1, 32>}, {pipeline_mode = #tpu.pipeline_mode<synchronous>, transform_indices = @transform_8, window_bounds = array<i64: 32, 128>}, {pipeline_mode = #tpu.pipeline_mode<synchronous>, transform_indices = @transform_9, window_bounds = array<i64: 1, 128>}, {pipeline_mode = #tpu.pipeline_mode<synchronous>, transform_indices = @transform_10, window_bounds = array<i64: 128, 64>}, {pipeline_mode = #tpu.pipeline_mode<synchronous>, transform_indices = @transform_11, window_bounds = array<i64: 1, 64>}, {pipeline_mode = #tpu.pipeline_mode<synchronous>, transform_indices = @transform_12, window_bounds = array<i64: 64, 4>}, {pipeline_mode = #tpu.pipeline_mode<synchronous>, transform_indices = @transform_13, window_bounds = array<i64: 1, 4>}, {pipeline_mode = #tpu.pipeline_mode<synchronous>, transform_indices = @transform_14, window_bounds = array<i64: 2, 4>}]} {
    %c0 = arith.constant 0 : index
    %c0_0 = arith.constant 0 : index
    %0 = vector.load %arg1[%c0, %c0_0] : memref<2x32xf32, #tpu.memory_space<vmem>>, vector<2x32xf32>
    %c0_1 = arith.constant 0 : index
    %c0_2 = arith.constant 0 : index
    %1 = vector.load %arg2[%c0_1, %c0_2] : memref<2x4xf32, #tpu.memory_space<vmem>>, vector<2x4xf32>
    %c0_3 = arith.constant 0 : index
    %c0_4 = arith.constant 0 : index
    %2 = vector.load %arg3[%c0_3, %c0_4] : memref<4x32xf32, #tpu.memory_space<vmem>>, vector<4x32xf32>
    %cst = arith.constant dense<0.000000e+00> : vector<2x32xf32>
    %3 = tpu.matmul %1, %2, %cst {dimension_numbers = #tpu.dot_dimension_numbers<[1], [0], [0], [1], [0, 0, 1, 1], [], []>} : vector<2x4xf32>, vector<4x32xf32>, vector<2x32xf32> -> vector<2x32xf32>
    %c0_5 = arith.constant 0 : index
    %c0_6 = arith.constant 0 : index
    %4 = vector.load %arg4[%c0_5, %c0_6] : memref<1x32xf32, #tpu.memory_space<vmem>>, vector<1x32xf32>
    %5 = vector.broadcast %4 : vector<1x32xf32> to vector<2x32xf32>
    %6 = arith.addf %3, %5 : vector<2x32xf32>
    %cst_7 = arith.constant 5.000000e-01 : f32
    %7 = vector.broadcast %cst_7 : f32 to vector<2x32xf32>
    %8 = arith.mulf %7, %6 : vector<2x32xf32>
    %cst_8 = arith.constant 0.707106769 : f32
    %9 = vector.broadcast %cst_8 : f32 to vector<2x32xf32>
    %10 = arith.mulf %6, %9 : vector<2x32xf32>
    %11 = math.erf %10 : vector<2x32xf32>
    %cst_9 = arith.constant 1.000000e+00 : f32
    %12 = vector.broadcast %cst_9 : f32 to vector<2x32xf32>
    %13 = arith.addf %12, %11 : vector<2x32xf32>
    %14 = arith.mulf %8, %13 : vector<2x32xf32>
    %c0_10 = arith.constant 0 : index
    %c0_11 = arith.constant 0 : index
    %15 = vector.load %arg5[%c0_10, %c0_11] : memref<32x32xf32, #tpu.memory_space<vmem>>, vector<32x32xf32>
    %cst_12 = arith.constant dense<0.000000e+00> : vector<2x32xf32>
    %16 = tpu.matmul %14, %15, %cst_12 {dimension_numbers = #tpu.dot_dimension_numbers<[1], [0], [0], [1], [0, 0, 1, 1], [], []>} : vector<2x32xf32>, vector<32x32xf32>, vector<2x32xf32> -> vector<2x32xf32>
    %c0_13 = arith.constant 0 : index
    %c0_14 = arith.constant 0 : index
    %17 = vector.load %arg6[%c0_13, %c0_14] : memref<1x32xf32, #tpu.memory_space<vmem>>, vector<1x32xf32>
    %18 = vector.broadcast %17 : vector<1x32xf32> to vector<2x32xf32>
    %19 = arith.addf %16, %18 : vector<2x32xf32>
    %cst_15 = arith.constant 5.000000e-01 : f32
    %20 = vector.broadcast %cst_15 : f32 to vector<2x32xf32>
    %21 = arith.mulf %20, %19 : vector<2x32xf32>
    %cst_16 = arith.constant 0.707106769 : f32
    %22 = vector.broadcast %cst_16 : f32 to vector<2x32xf32>
    %23 = arith.mulf %19, %22 : vector<2x32xf32>
    %24 = math.erf %23 : vector<2x32xf32>
    %cst_17 = arith.constant 1.000000e+00 : f32
    %25 = vector.broadcast %cst_17 : f32 to vector<2x32xf32>
    %26 = arith.addf %25, %24 : vector<2x32xf32>
    %27 = arith.mulf %21, %26 : vector<2x32xf32>
    %c0_18 = arith.constant 0 : index
    %c0_19 = arith.constant 0 : index
    %28 = vector.load %arg7[%c0_18, %c0_19] : memref<32x32xf32, #tpu.memory_space<vmem>>, vector<32x32xf32>
    %cst_20 = arith.constant dense<0.000000e+00> : vector<2x32xf32>
    %29 = tpu.matmul %27, %28, %cst_20 {dimension_numbers = #tpu.dot_dimension_numbers<[1], [0], [0], [1], [0, 0, 1, 1], [], []>} : vector<2x32xf32>, vector<32x32xf32>, vector<2x32xf32> -> vector<2x32xf32>
    %c0_21 = arith.constant 0 : index
    %c0_22 = arith.constant 0 : index
    %30 = vector.load %arg8[%c0_21, %c0_22] : memref<1x32xf32, #tpu.memory_space<vmem>>, vector<1x32xf32>
    %31 = vector.broadcast %30 : vector<1x32xf32> to vector<2x32xf32>
    %32 = arith.addf %29, %31 : vector<2x32xf32>
    %cst_23 = arith.constant 5.000000e-01 : f32
    %33 = vector.broadcast %cst_23 : f32 to vector<2x32xf32>
    %34 = arith.mulf %33, %32 : vector<2x32xf32>
    %cst_24 = arith.constant 0.707106769 : f32
    %35 = vector.broadcast %cst_24 : f32 to vector<2x32xf32>
    %36 = arith.mulf %32, %35 : vector<2x32xf32>
    %37 = math.erf %36 : vector<2x32xf32>
    %cst_25 = arith.constant 1.000000e+00 : f32
    %38 = vector.broadcast %cst_25 : f32 to vector<2x32xf32>
    %39 = arith.addf %38, %37 : vector<2x32xf32>
    %40 = arith.mulf %34, %39 : vector<2x32xf32>
    %c0_26 = arith.constant 0 : index
    %c0_27 = arith.constant 0 : index
    %41 = vector.load %arg9[%c0_26, %c0_27] : memref<32x128xf32, #tpu.memory_space<vmem>>, vector<32x128xf32>
    %cst_28 = arith.constant dense<0.000000e+00> : vector<2x128xf32>
    %42 = tpu.matmul %0, %41, %cst_28 {dimension_numbers = #tpu.dot_dimension_numbers<[1], [0], [0], [1], [0, 0, 1, 1], [], []>} : vector<2x32xf32>, vector<32x128xf32>, vector<2x128xf32> -> vector<2x128xf32>
    %c0_29 = arith.constant 0 : index
    %c0_30 = arith.constant 0 : index
    %43 = vector.load %arg10[%c0_29, %c0_30] : memref<1x128xf32, #tpu.memory_space<vmem>>, vector<1x128xf32>
    %44 = vector.broadcast %43 : vector<1x128xf32> to vector<2x128xf32>
    %45 = arith.addf %42, %44 : vector<2x128xf32>
    %cst_31 = arith.constant 5.000000e-01 : f32
    %46 = vector.broadcast %cst_31 : f32 to vector<2x128xf32>
    %47 = arith.mulf %46, %45 : vector<2x128xf32>
    %cst_32 = arith.constant 0.707106769 : f32
    %48 = vector.broadcast %cst_32 : f32 to vector<2x128xf32>
    %49 = arith.mulf %45, %48 : vector<2x128xf32>
    %50 = math.erf %49 : vector<2x128xf32>
    %cst_33 = arith.constant 1.000000e+00 : f32
    %51 = vector.broadcast %cst_33 : f32 to vector<2x128xf32>
    %52 = arith.addf %51, %50 : vector<2x128xf32>
    %53 = arith.mulf %47, %52 : vector<2x128xf32>
    %c0_34 = arith.constant 0 : index
    %c0_35 = arith.constant 0 : index
    %54 = vector.load %arg11[%c0_34, %c0_35] : memref<128x64xf32, #tpu.memory_space<vmem>>, vector<128x64xf32>
    %cst_36 = arith.constant dense<0.000000e+00> : vector<2x64xf32>
    %55 = tpu.matmul %53, %54, %cst_36 {dimension_numbers = #tpu.dot_dimension_numbers<[1], [0], [0], [1], [0, 0, 1, 1], [], []>} : vector<2x128xf32>, vector<128x64xf32>, vector<2x64xf32> -> vector<2x64xf32>
    %c0_37 = arith.constant 0 : index
    %c0_38 = arith.constant 0 : index
    %56 = vector.load %arg12[%c0_37, %c0_38] : memref<1x64xf32, #tpu.memory_space<vmem>>, vector<1x64xf32>
    %57 = vector.broadcast %56 : vector<1x64xf32> to vector<2x64xf32>
    %58 = arith.addf %55, %57 : vector<2x64xf32>
    %59 = arith.negf %58 : vector<2x64xf32>
    %60 = math.exp %59 : vector<2x64xf32>
    %cst_39 = arith.constant 1.000000e+00 : f32
    %61 = vector.broadcast %cst_39 : f32 to vector<2x64xf32>
    %62 = arith.addf %61, %60 : vector<2x64xf32>
    %63 = arith.divf %61, %62 : vector<2x64xf32>
    %64 = vector.extract_strided_slice %63 {offsets = [0, 0], sizes = [2, 32], strides = [1, 1]} : vector<2x64xf32> to vector<2x32xf32>
    %65 = arith.mulf %0, %64 : vector<2x32xf32>
    %66 = vector.extract_strided_slice %63 {offsets = [0, 32], sizes = [2, 32], strides = [1, 1]} : vector<2x64xf32> to vector<2x32xf32>
    %67 = arith.mulf %40, %66 : vector<2x32xf32>
    %68 = tpu.concatenate %65, %67 in 1 : vector<2x32xf32>, vector<2x32xf32> -> vector<2x64xf32>
    %c0_40 = arith.constant 0 : index
    %c0_41 = arith.constant 0 : index
    %69 = vector.load %arg13[%c0_40, %c0_41] : memref<64x4xf32, #tpu.memory_space<vmem>>, vector<64x4xf32>
    %cst_42 = arith.constant dense<0.000000e+00> : vector<2x4xf32>
    %70 = tpu.matmul %68, %69, %cst_42 {dimension_numbers = #tpu.dot_dimension_numbers<[1], [0], [0], [1], [0, 0, 1, 1], [], []>} : vector<2x64xf32>, vector<64x4xf32>, vector<2x4xf32> -> vector<2x4xf32>
    %c0_43 = arith.constant 0 : index
    %c0_44 = arith.constant 0 : index
    %71 = vector.load %arg14[%c0_43, %c0_44] : memref<1x4xf32, #tpu.memory_space<vmem>>, vector<1x4xf32>
    %72 = vector.broadcast %71 : vector<1x4xf32> to vector<2x4xf32>
    %73 = arith.addf %70, %72 : vector<2x4xf32>
    %c0_45 = arith.constant 0 : index
    %c0_46 = arith.constant 0 : index
    %74 = vector.load %arg15[%c0_45, %c0_46] : memref<2x4xf32, #tpu.memory_space<vmem>>, vector<2x4xf32>
    tpu.vector_store %arg15[%c0_45, %c0_46], %73 {strides = array<i32>} : memref<2x4xf32, #tpu.memory_space<vmem>>, vector<2x4xf32>,
    return
  }
  func.func @transform_0(%arg0: i32) -> (i32, i32) {
    %c0_i32 = arith.constant 0 : i32
    %c0_i32_0 = arith.constant 0 : i32
    %c0_i32_1 = arith.constant 0 : i32
    return %c0_i32, %c0_i32_0 : i32, i32
  }
  func.func @transform_1(%arg0: i32) -> (i32, i32) {
    %c0_i32 = arith.constant 0 : i32
    %c0_i32_0 = arith.constant 0 : i32
    %c0_i32_1 = arith.constant 0 : i32
    return %c0_i32, %c0_i32_0 : i32, i32
  }
  func.func @transform_2(%arg0: i32) -> (i32, i32) {
    %c0_i32 = arith.constant 0 : i32
    %c0_i32_0 = arith.constant 0 : i32
    %c0_i32_1 = arith.constant 0 : i32
    return %c0_i32, %c0_i32_0 : i32, i32
  }
  func.func @transform_3(%arg0: i32) -> (i32, i32) {
    %c0_i32 = arith.constant 0 : i32
    %c0_i32_0 = arith.constant 0 : i32
    %c0_i32_1 = arith.constant 0 : i32
    return %c0_i32, %c0_i32_0 : i32, i32
  }
  func.func @transform_4(%arg0: i32) -> (i32, i32) {
    %c0_i32 = arith.constant 0 : i32
    %c0_i32_0 = arith.constant 0 : i32
    %c0_i32_1 = arith.constant 0 : i32
    return %c0_i32, %c0_i32_0 : i32, i32
  }
  func.func @transform_5(%arg0: i32) -> (i32, i32) {
    %c0_i32 = arith.constant 0 : i32
    %c0_i32_0 = arith.constant 0 : i32
    %c0_i32_1 = arith.constant 0 : i32
    return %c0_i32, %c0_i32_0 : i32, i32
  }
  func.func @transform_6(%arg0: i32) -> (i32, i32) {
    %c0_i32 = arith.constant 0 : i32
    %c0_i32_0 = arith.constant 0 : i32
    %c0_i32_1 = arith.constant 0 : i32
    return %c0_i32, %c0_i32_0 : i32, i32
  }
  func.func @transform_7(%arg0: i32) -> (i32, i32) {
    %c0_i32 = arith.constant 0 : i32
    %c0_i32_0 = arith.constant 0 : i32
    %c0_i32_1 = arith.constant 0 : i32
    return %c0_i32, %c0_i32_0 : i32, i32
  }
  func.func @transform_8(%arg0: i32) -> (i32, i32) {
    %c0_i32 = arith.constant 0 : i32
    %c0_i32_0 = arith.constant 0 : i32
    %c0_i32_1 = arith.constant 0 : i32
    return %c0_i32, %c0_i32_0 : i32, i32
  }
  func.func @transform_9(%arg0: i32) -> (i32, i32) {
    %c0_i32 = arith.constant 0 : i32
    %c0_i32_0 = arith.constant 0 : i32
    %c0_i32_1 = arith.constant 0 : i32
    return %c0_i32, %c0_i32_0 : i32, i32
  }
  func.func @transform_10(%arg0: i32) -> (i32, i32) {
    %c0_i32 = arith.constant 0 : i32
    %c0_i32_0 = arith.constant 0 : i32
    %c0_i32_1 = arith.constant 0 : i32
    return %c0_i32, %c0_i32_0 : i32, i32
  }
  func.func @transform_11(%arg0: i32) -> (i32, i32) {
    %c0_i32 = arith.constant 0 : i32
    %c0_i32_0 = arith.constant 0 : i32
    %c0_i32_1 = arith.constant 0 : i32
    return %c0_i32, %c0_i32_0 : i32, i32
  }
  func.func @transform_12(%arg0: i32) -> (i32, i32) {
    %c0_i32 = arith.constant 0 : i32
    %c0_i32_0 = arith.constant 0 : i32
    %c0_i32_1 = arith.constant 0 : i32
    return %c0_i32, %c0_i32_0 : i32, i32
  }
  func.func @transform_13(%arg0: i32) -> (i32, i32) {
    %c0_i32 = arith.constant 0 : i32
    %c0_i32_0 = arith.constant 0 : i32
    %c0_i32_1 = arith.constant 0 : i32
    return %c0_i32, %c0_i32_0 : i32, i32
  }
  func.func @transform_14(%arg0: i32) -> (i32, i32) {
    %c0_i32 = arith.constant 0 : i32
    %c0_i32_0 = arith.constant 0 : i32
    %c0_i32_1 = arith.constant 0 : i32
    return %c0_i32, %c0_i32_0 : i32, i32
  }
}

</mosaic_0001>

<bundles_post_ra>
// kernel: graph_recur_net_gate_forward.3
= control target key start
LH: loop header
LB: loop body
LE: loop exit
PB: predicated region body
PF: predicated region fallthrough
CT: control target
= control target key end

     0   :  { %v924_v0 = vmov 0.0   ;;  %vm925_vm0 = vmmov 0   ;;  %vm71_vm1 = vcmask 392192   ;;  %s1182_s1 = inlined_call_operand.vmem [shape: bf16[48,128], index: 1, kind: input, shape index: {}]   ;;  %s1183_s3 = inlined_call_operand.vmem [shape: bf16[128,128], index: 3, kind: input, shape index: {}]   ;;  %s1184_s0 = inlined_call_operand.vmem [shape: bf16[16,48], index: 0, kind: input, shape index: {}]   ;;  %s1185_s5 = inlined_call_operand.vmem [shape: bf16[128,128], index: 5, kind: input, shape index: {}]   ;;  %s1186_s2 = inlined_call_operand.vmem [shape: f32[1,128], index: 2, kind: input, shape index: {}]   ;;  %s1187_s7 = inlined_call_operand.vmem [shape: bf16[128,512], index: 7, kind: input, shape index: {}]   ;;  %s1188_s4 = inlined_call_operand.vmem [shape: f32[1,128], index: 4, kind: input, shape index: {}]   ;;  %s1189_s6 = inlined_call_operand.vmem [shape: f32[1,128], index: 6, kind: input, shape index: {}]   ;;  %s1190_s8 = inlined_call_operand.vmem [shape: f32[1,512], index: 8, kind: input, shape index: {}]   ;;  %s1191_s9 = inlined_call_operand.vmem [shape: bf16[16,512], index: 9, kind: output, shape index: {}]  }
   0x1   :  { %791 = vmatprep.subr.bf16.mxu0 %v924_v0  ;;  %v844_v1 = vld [vmem:[%s1182_s1 + $0x10] sm:$0xff]   ;;  %797 = vmatprep.mubr.msk.bf16.mxu0 %vm925_vm0, %v924_v0  ;;  %v845_v2 = vld [vmem:[%s1182_s1 + $0x8] sm:$0xff]   ;;  %v848_v3 = vld [vmem:[%s1183_s3 + $0x38] sm:$0xff]  }
   0x2   :  { %801 = vmatprep.subr.bf16.mxu1 %v924_v0  ;;  %817 = vmatprep.mubr.msk.bf16.mxu1 %vm925_vm0, %v924_v0  ;;  %v846_v4 = vld [vmem:[%s1182_s1] sm:$0xff]   ;;  %v849_v6 = vld [vmem:[%s1183_s3 + $0x30] sm:$0xff]   ;;  %v850_v7 = vld [vmem:[%s1183_s3 + $0x28] sm:$0xff]  }
   0x3   :  { %792 = vmatpush3.bf16.msra.mxu0 %v844_v1  ;;  %802 = vmatpush3.bf16.msra.mxu1 %v848_v3  ;;  %v847_v5 = vld [vmem:[%s1184_s0] sm:$0xff]   ;;  %v852_v9 = vld [vmem:[%s1183_s3 + $0x18] sm:$0xff]   ;;  %v853_v10 = vld [vmem:[%s1183_s3 + $0x10] sm:$0xff]  }
   0x4   :  { %793 = vmatprep.subr.bf16.mxu0 %v924_v0  ;;  %803 = vmatprep.subr.bf16.mxu1 %v924_v0  ;;  %v851_v8 = vld [vmem:[%s1183_s3 + $0x20] sm:$0xff]   ;;  %v854_v11 = vld [vmem:[%s1183_s3 + $0x8] sm:$0xff]   ;;  %v856_v13 = vld [vmem:[%s1185_s5 + $0x38] sm:$0xff]  }
   0x5   :  { %v855_v12 = vld [vmem:[%s1183_s3] sm:$0xff]   ;;  %v857_v32 = vld [vmem:[%s1185_s5 + $0x30] sm:$0xff]   ;;  %v858_v33 = vld [vmem:[%s1185_s5 + $0x28] sm:$0xff]  }
   0x6   :  { %v705_v14 = vld [vmem:[%s1186_s2] ss:$0 sm:$0xff]  ;;  %v860_v35 = vld [vmem:[%s1185_s5 + $0x18] sm:$0xff]   ;;  %v861_v36 = vld [vmem:[%s1185_s5 + $0x10] sm:$0xff]  }
   0x7   :  { %794 = vmatpush3.bf16.msra.mxu0 %v845_v2  ;;  %804 = vmatpush3.bf16.msra.mxu1 %v849_v6  ;;  %v859_v34 = vld [vmem:[%s1185_s5 + $0x20] sm:$0xff]   ;;  %v862_v37 = vld [vmem:[%s1185_s5 + $0x8] sm:$0xff]  }
   0x8   :  { %795 = vmatprep.subr.bf16.mxu0 %v924_v0  ;;  %805 = vmatprep.subr.bf16.mxu1 %v924_v0  ;;  %v863_v38 = vld [vmem:[%s1185_s5] sm:$0xff]   ;;  %v869_v41 = vld [vmem:[%s1187_s7 + $0xec] ss:$16 sps:$4 sm:$0xff]   ;;  %v867_v59 = vld [vmem:[%s1187_s7 + $0xe8] ss:$16 sps:$4 sm:$0xff]  }
   0x9   :  { %v864_v39 = vld [vmem:[%s1187_s7 + $0xe0] ss:$16 sps:$4 sm:$0xff]   ;;  %v866_v40 = vld [vmem:[%s1187_s7 + $0xe4] ss:$16 sps:$4 sm:$0xff]   ;;  %v875_v62 = vld [vmem:[%s1187_s7 + $0xcc] ss:$16 sps:$4 sm:$0xff]  }
   0xa   :  { %v711_v42 = vld [vmem:[%s1188_s4] ss:$0 sm:$0xff]  ;;  %v872_v61 = vld [vmem:[%s1187_s7 + $0xc4] ss:$16 sps:$4 sm:$0xff]   ;;  %v881_v2 = vld [vmem:[%s1187_s7 + $0xac] ss:$16 sps:$4 sm:$0xff]  }
   0xb   :  { %796 = vmatpush3.bf16.msra.mxu0 %v846_v4  ;;  %806 = vmatpush3.bf16.msra.mxu1 %v850_v7  ;;  %v870_v63 = vld [vmem:[%s1187_s7 + $0xc0] ss:$16 sps:$4 sm:$0xff]   ;;  %v878_v1 = vld [vmem:[%s1187_s7 + $0xa4] ss:$16 sps:$4 sm:$0xff]   ;;  %v879_v4 = vld [vmem:[%s1187_s7 + $0xa8] ss:$16 sps:$4 sm:$0xff]  }
   0xc   :  { %821 = vmatprep.subr.bf16.mxu0 %v924_v0  ;;  %807 = vmatprep.subr.bf16.mxu1 %v924_v0  ;;  %v876_v3 = vld [vmem:[%s1187_s7 + $0xa0] ss:$16 sps:$4 sm:$0xff]   ;;  %v887_v6 = vld [vmem:[%s1187_s7 + $0x8c] ss:$16 sps:$4 sm:$0xff]  }
   0xd   :  { %v882_v7 = vld [vmem:[%s1187_s7 + $0x80] ss:$16 sps:$4 sm:$0xff]  }
   0xe   :  { %798 = vmatmul.mubr.msk.bf16.vlgmr.msra.gmra.mxu0 %vm71_vm1, %v847_v5  ;;  %v884_v5 = vld [vmem:[%s1187_s7 + $0x84] ss:$16 sps:$4 sm:$0xff]  }
   0xf   :  { %837 = vmatprep.mubr.msk.bf16.mxu0 %vm925_vm0, %v924_v0  ;;  %808 = vmatpush3.bf16.msra.mxu1 %v851_v8  ;;  %v885_v8 = vld [vmem:[%s1187_s7 + $0x88] ss:$16 sps:$4 sm:$0xff]  }
  0x10   :  { %809 = vmatprep.subr.bf16.mxu1 %v924_v0  ;;  %822 = vmatpush3.bf16.msra.mxu0 %v856_v13  ;;  %v896_v13 = vld [vmem:[%s1187_s7 + $0x44] ss:$16 sps:$4 sm:$0xff]  }
  0x11   :  { %823 = vmatprep.subr.bf16.mxu0 %v924_v0 }
  0x13   :  { %810 = vmatpush3.bf16.msra.mxu1 %v852_v9  ;;  %v890_v9 = vld [vmem:[%s1187_s7 + $0x64] ss:$16 sps:$4 sm:$0xff]  }
  0x14   :  { %811 = vmatprep.subr.bf16.mxu1 %v924_v0  ;;  %824 = vmatpush3.bf16.msra.mxu0 %v857_v32 }
  0x15   :  { %825 = vmatprep.subr.bf16.mxu0 %v924_v0 }
  0x17   :  { %812 = vmatpush3.bf16.msra.mxu1 %v853_v10  ;;  %v893_v10 = vld [vmem:[%s1187_s7 + $0x6c] ss:$16 sps:$4 sm:$0xff]  }
  0x18   :  { %813 = vmatprep.subr.bf16.mxu1 %v924_v0  ;;  %826 = vmatpush3.bf16.msra.mxu0 %v858_v33 }
  0x19   :  { %827 = vmatprep.subr.bf16.mxu0 %v924_v0 }
  0x1b   :  { %814 = vmatpush3.bf16.msra.mxu1 %v854_v11  ;;  %v888_v11 = vld [vmem:[%s1187_s7 + $0x60] ss:$16 sps:$4 sm:$0xff]  }
  0x1c   :  { %815 = vmatprep.subr.bf16.mxu1 %v924_v0  ;;  %828 = vmatpush3.bf16.msra.mxu0 %v859_v34 }
  0x1d   :  { %829 = vmatprep.subr.bf16.mxu0 %v924_v0 }
  0x1f   :  { %816 = vmatpush3.bf16.msra.mxu1 %v855_v12  ;;  %v891_v12 = vld [vmem:[%s1187_s7 + $0x68] ss:$16 sps:$4 sm:$0xff]  }
  0x20   :  { %830 = vmatpush3.bf16.msra.mxu0 %v860_v35  ;;  %587 = vmatprep.subr.bf16.mxu1 %v866_v40 }
  0x21   :  { %831 = vmatprep.subr.bf16.mxu0 %v924_v0 }
  0x24   :  { %832 = vmatpush3.bf16.msra.mxu0 %v861_v36 }
  0x25   :  { %833 = vmatprep.subr.bf16.mxu0 %v924_v0 }
  0x28   :  { %834 = vmatpush3.bf16.msra.mxu0 %v862_v37 }
  0x29   :  { %835 = vmatprep.subr.bf16.mxu0 %v924_v0  ;;  %v873_v0 = vld [vmem:[%s1187_s7 + $0xc8] ss:$16 sps:$4 sm:$0xff]  }
  0x2c   :  { %836 = vmatpush3.bf16.msra.mxu0 %v863_v38 }
  0x2d   :  { %630 = vmatprep.subr.bf16.mxu0 %v869_v41 }
  0xce   :  { %v109_v15 = vpop.f32.mrf.mxu0 }
  0xcf   :  { %v110_v16 = vadd.f32 %v705_v14, %v109_v15  ;;  %v894_v15 = vld [vmem:[%s1187_s7 + $0x40] ss:$16 sps:$4 sm:$0xff]  }
  0xd0   :  { %v799_v17 = vpop.f32.mrf.mxu0 }
  0xd1   :  { %v118_v18 = vmul.f32 0.70710677, %v110_v16  ;;  %v116_v26 = vmul.f32 0.5, %v110_v16  ;;  %v897_v16 = vld [vmem:[%s1187_s7 + $0x48] ss:$16 sps:$4 sm:$0xff]  }
  0xd2   :  { %v112_v19 = vpop.f32.mrf.mxu0  ;;  %v902_v17 = vld [vmem:[%s1187_s7 + $0x24] ss:$16 sps:$4 sm:$0xff]  }
  0xd3   :  { %912 = verf.f32 %v118_v18  ;;  %v113_v20 = vadd.f32 %v705_v14, %v112_v19  ;;  %v899_v14 = vld [vmem:[%s1187_s7 + $0x4c] ss:$16 sps:$4 sm:$0xff]   ;;  %v900_v19 = vld [vmem:[%s1187_s7 + $0x20] ss:$16 sps:$4 sm:$0xff]  }
  0xd4   :  { %v800_v21 = vpop.f32.mrf.mxu0  ;;  %v905_v18 = vld [vmem:[%s1187_s7 + $0x2c] ss:$16 sps:$4 sm:$0xff]  }
  0xd5   :  { %v119_v22 = vmul.f32 0.70710677, %v113_v20  ;;  %v117_v27 = vmul.f32 0.5, %v113_v20  ;;  %v903_v20 = vld [vmem:[%s1187_s7 + $0x28] ss:$16 sps:$4 sm:$0xff]  }
  0xd6   :  { %v908_v21 = vld [vmem:[%s1187_s7 + $0x4] ss:$16 sps:$4 sm:$0xff]  }
  0xd7   :  { %914 = verf.f32 %v119_v22  ;;  %v911_v22 = vld [vmem:[%s1187_s7 + $0xc] ss:$16 sps:$4 sm:$0xff]  }
  0xe0   :  { %v913_v23 = vpop.eup %912 }
  0xe1   :  { %v122_v24 = vadd.f32 1.0, %v913_v23  ;;  %v906_v23 = vld [vmem:[%s1187_s7] ss:$16 sps:$4 sm:$0xff]  }
  0xe3   :  { %v124_v29 = vmul.f32 %v122_v24, %v116_v26  ;;  %v909_v24 = vld [vmem:[%s1187_s7 + $0x8] ss:$16 sps:$4 sm:$0xff]   ;;  %v720_v26 = vld [vmem:[%s1189_s6] ss:$0 sm:$0xff] }
  0xe4   :  { %v915_v25 = vpop.eup %914 }
  0xe5   :  { %v123_v28 = vadd.f32 1.0, %v915_v25  ;;  %v926_v25 = vmov 0  }
  0xe7   :  { %v125_v30 = vmul.f32 %v123_v28, %v117_v27 }
  0xe9   :  { %v126_v31 = vpack.c.bf16 %v125_v30, %v124_v29 }
  0xeb   :  { %818 = vmatmul.mubr.bf16.vlgmr.msra.gmra.mxu1 %v126_v31 }
  0xec   :  { %588 = vmatpush1.bf16.msra.mxu1 %v864_v39  ;;  %619 = vmatprep.mubr.bf16.mxu1 %v926_v25 }
  0xed   :  { %589 = vmatprep.subr.bf16.mxu1 %v872_v61 }
  0xf0   :  { %590 = vmatpush1.bf16.msra.mxu1 %v870_v63 }
  0xf1   :  { %591 = vmatprep.subr.bf16.mxu1 %v878_v1 }
  0xf4   :  { %592 = vmatpush1.bf16.msra.mxu1 %v876_v3 }
  0xf5   :  { %593 = vmatprep.subr.bf16.mxu1 %v884_v5 }
  0xf8   :  { %594 = vmatpush1.bf16.msra.mxu1 %v882_v7 }
  0xf9   :  { %595 = vmatprep.subr.bf16.mxu1 %v890_v9 }
  0xfc   :  { %596 = vmatpush1.bf16.msra.mxu1 %v888_v11 }
  0xfd   :  { %597 = vmatprep.subr.bf16.mxu1 %v896_v13 }
 0x100   :  { %598 = vmatpush1.bf16.msra.mxu1 %v894_v15 }
 0x101   :  { %599 = vmatprep.subr.bf16.mxu1 %v902_v17 }
 0x104   :  { %600 = vmatpush1.bf16.msra.mxu1 %v900_v19 }
 0x105   :  { %601 = vmatprep.subr.bf16.mxu1 %v908_v21 }
 0x108   :  { %602 = vmatpush1.bf16.msra.mxu1 %v906_v23 }
 0x1ab   :  { %v232_v43 = vpop.f32.mrf.mxu1 }
 0x1ac   :  { %v233_v44 = vadd.f32 %v711_v42, %v232_v43 }
 0x1ad   :  { %v819_v45 = vpop.f32.mrf.mxu1 }
 0x1ae   :  { %v241_v46 = vmul.f32 0.70710677, %v233_v44  ;;  %v239_v54 = vmul.f32 0.5, %v233_v44  ;;  %v407_v44 = vlaneseq }
 0x1af   :  { %v235_v47 = vpop.f32.mrf.mxu1 }
 0x1b0   :  { %916 = verf.f32 %v241_v46  ;;  %v236_v48 = vadd.f32 %v711_v42, %v235_v47  ;;  %v408_v45 = vshrl.u32 %v407_v44, 7 }
 0x1b1   :  { %v820_v49 = vpop.f32.mrf.mxu1 }
 0x1b2   :  { %v242_v50 = vmul.f32 0.70710677, %v236_v48  ;;  %v240_v55 = vmul.f32 0.5, %v236_v48  ;;  %v409_v46 = vsub.s32 0, %v408_v45  ;;  %v417_v47 = vsub.s32 2, %v408_v45 }
 0x1b3   :  { %v413_v48 = vsub.s32 1, %v408_v45  ;;  %v421_v49 = vsub.s32 3, %v408_v45 }
 0x1b4   :  { %918 = verf.f32 %v242_v50  ;;  %v405_v50 = vld [vmem:[%s1190_s8] sm:$0xf] }
 0x1bd   :  { %v917_v51 = vpop.eup %916 }
 0x1be   :  { %v245_v52 = vadd.f32 1.0, %v917_v51  ;;  %v410_v51 = vrot.slane %v405_v50, %v409_v46 }
 0x1c0   :  { %v247_v57 = vmul.f32 %v245_v52, %v239_v54  ;;  %v418_v52 = vrot.slane %v405_v50, %v417_v47  ;;  %v422_v54 = vrot.slane %v405_v50, %v421_v49 }
 0x1c1   :  { %v919_v53 = vpop.eup %918 }
 0x1c2   :  { %v246_v56 = vadd.f32 1.0, %v919_v53  ;;  %v414_v53 = vrot.slane %v405_v50, %v413_v48 }
 0x1c4   :  { %v248_v58 = vmul.f32 %v246_v56, %v240_v55 }
 0x1c6   :  { %v249_v60 = vpack.c.bf16 %v248_v58, %v247_v57 }
 0x1c8   :  { %838 = vmatmul.mubr.bf16.vlgmr.msra.gmra.mxu0 %v249_v60 }
 0x1c9   :  { %631 = vmatpush1.bf16.msra.mxu0 %v867_v59  ;;  %662 = vmatprep.mubr.bf16.mxu0 %v926_v25 }
 0x1ca   :  { %632 = vmatprep.subr.bf16.mxu0 %v875_v62 }
 0x1cd   :  { %633 = vmatpush1.bf16.msra.mxu0 %v873_v0 }
 0x1ce   :  { %634 = vmatprep.subr.bf16.mxu0 %v881_v2 }
 0x1d1   :  { %635 = vmatpush1.bf16.msra.mxu0 %v879_v4 }
 0x1d2   :  { %636 = vmatprep.subr.bf16.mxu0 %v887_v6 }
 0x1d5   :  { %637 = vmatpush1.bf16.msra.mxu0 %v885_v8 }
 0x1d6   :  { %638 = vmatprep.subr.bf16.mxu0 %v893_v10 }
 0x1d9   :  { %639 = vmatpush1.bf16.msra.mxu0 %v891_v12 }
 0x1da   :  { %640 = vmatprep.subr.bf16.mxu0 %v899_v14 }
 0x1dd   :  { %641 = vmatpush1.bf16.msra.mxu0 %v897_v16 }
 0x1de   :  { %642 = vmatprep.subr.bf16.mxu0 %v905_v18 }
 0x1e1   :  { %643 = vmatpush1.bf16.msra.mxu0 %v903_v20 }
 0x1e2   :  { %644 = vmatprep.subr.bf16.mxu0 %v911_v22 }
 0x1e5   :  { %645 = vmatpush1.bf16.msra.mxu0 %v909_v24 }
 0x288   :  { %v355_v27 = vpop.f32.mrf.mxu0 }
 0x289   :  { %v356_v28 = vadd.f32 %v720_v26, %v355_v27 }
 0x28a   :  { %v839_v29 = vpop.f32.mrf.mxu0 }
 0x28b   :  { %v364_v30 = vmul.f32 0.70710677, %v356_v28  ;;  %v362_v38 = vmul.f32 0.5, %v356_v28 }
 0x28c   :  { %v358_v31 = vpop.f32.mrf.mxu0 }
 0x28d   :  { %920 = verf.f32 %v364_v30  ;;  %v359_v32 = vadd.f32 %v720_v26, %v358_v31 }
 0x28e   :  { %v840_v33 = vpop.f32.mrf.mxu0 }
 0x28f   :  { %v365_v34 = vmul.f32 0.70710677, %v359_v32  ;;  %v363_v39 = vmul.f32 0.5, %v359_v32 }
 0x291   :  { %922 = verf.f32 %v365_v34 }
 0x29a   :  { %v921_v35 = vpop.eup %920 }
 0x29b   :  { %v368_v36 = vadd.f32 1.0, %v921_v35 }
 0x29d   :  { %v370_v41 = vmul.f32 %v368_v36, %v362_v38 }
 0x29e   :  { %v923_v37 = vpop.eup %922 }
 0x29f   :  { %v369_v40 = vadd.f32 1.0, %v923_v37 }
 0x2a1   :  { %v371_v42 = vmul.f32 %v369_v40, %v363_v39 }
 0x2a3   :  { %v372_v43 = vpack.c.bf16 %v371_v42, %v370_v41 }
 0x2a5   :  { %620 = vmatmul.mubr.bf16.vlgmr.msra.gmra.mxu1 %v372_v43  ;;  %663 = vmatmul.mubr.bf16.vlgmr.msra.gmra.mxu0 %v372_v43 }
 0x365   :  { %v621_v55 = vpop.f32.mrf.mxu1  ;;  %v664_v56 = vpop.f32.mrf.mxu0 }
 0x366   :  { %v622_v59 = vadd.f32 %v621_v55, %v410_v51  ;;  %v665_v60 = vadd.f32 %v664_v56, %v418_v52 }
 0x367   :  { %v623_v57 = vpop.f32.mrf.mxu1  ;;  %v666_v58 = vpop.f32.mrf.mxu0 }
 0x368   :  { %v624_v61 = vadd.f32 %v623_v57, %v414_v53  ;;  %v667_v62 = vadd.f32 %v666_v58, %v422_v54 }
 0x369   :  { %v625_v63 = vpop.f32.mrf.mxu1  ;;  %v668_v0 = vpop.f32.mrf.mxu0 }
 0x36a   :  { %v765_v1 = vpack.c.bf16 %v624_v61, %v622_v59  ;;  %v766_v2 = vpack.c.bf16 %v667_v62, %v665_v60  ;;  %v626_v5 = vadd.f32 %v625_v63, %v410_v51  ;;  %v669_v6 = vadd.f32 %v668_v0, %v418_v52 }
 0x36b   :  { %v627_v3 = vpop.f32.mrf.mxu1  ;;  %v670_v4 = vpop.f32.mrf.mxu0 }
 0x36c   :  { %697 = vst [vmem:[%s1191_s9] sm:$0xff] %v765_v1  ;;  %698 = vst [vmem:[%s1191_s9 + $0x8] sm:$0xff] %v766_v2  ;;  %v628_v7 = vadd.f32 %v627_v3, %v414_v53  ;;  %v671_v8 = vadd.f32 %v670_v4, %v422_v54 }
 0x36e   :  { %v767_v9 = vpack.c.bf16 %v628_v7, %v626_v5  ;;  %v768_v10 = vpack.c.bf16 %v671_v8, %v669_v6 }
 0x370   :  { %699 = vst [vmem:[%s1191_s9 + $0x10] sm:$0xff] %v767_v9  ;;  %700 = vst [vmem:[%s1191_s9 + $0x18] sm:$0xff] %v768_v10 }

// kernel: graph_recur_net_gate_forward.4
= control target key start
LH: loop header
LB: loop body
LE: loop exit
PB: predicated region body
PF: predicated region fallthrough
CT: control target
= control target key end

     0   :  { %v1615_v1 = vmov 0   ;;  %v1616_v2 = vmov 0.0   ;;  %v1617_v36 = vmov 1983009808   ;;  %v306_v38 = vlaneseq  ;;  %s2201_s1 = inlined_call_operand.vmem [shape: bf16[128,512], index: 1, kind: input, shape index: {}]   ;;  %s2202_s0 = inlined_call_operand.vmem [shape: bf16[8,2,512], index: 0, kind: input, shape index: {}]   ;;  %s2203_s2 = inlined_call_operand.vmem [shape: f32[2,128], index: 2, kind: output, shape index: {}]  }
   0x1   :  { %v1636_v0 = vld [vmem:[%s2201_s1 + $0xe4] ss:$16 sps:$4 sm:$0xff]   ;;  %247 = vmatprep.mubr.bf16.mxu0 %v1615_v1  ;;  %288 = vmatprep.mubr.bf16.mxu1 %v1615_v1  ;;  %16 = vst [vmem:[#allocation2] sm:$0x3] %v1616_v2  ;;  %17 = vst [vmem:[#allocation3] sm:$0x3] %v1616_v2  ;;  %v304_v37 = vunpack.c.l.s4 %v1617_v36 }
   0x2   :  { %v1643_v3 = vld [vmem:[%s2201_s1 + $0xec] ss:$16 sps:$4 sm:$0xff]   ;;  %215 = vmatprep.subr.bf16.mxu0 %v1636_v0  ;;  %v1649_v4 = vld [vmem:[%s2201_s1 + $0xe0] ss:$16 sps:$4 sm:$0xff]   ;;  %v1654_v5 = vld [vmem:[%s2201_s1 + $0xe8] ss:$16 sps:$4 sm:$0xff]  }
   0x3   :  { %256 = vmatprep.subr.bf16.mxu1 %v1643_v3  ;;  %v1660_v6 = vld [vmem:[%s2201_s1 + $0xc4] ss:$16 sps:$4 sm:$0xff]   ;;  %216 = vmatpush1.bf16.msra.mxu0 %v1649_v4  ;;  %v1667_v7 = vld [vmem:[%s2201_s1 + $0xcc] ss:$16 sps:$4 sm:$0xff]   ;;  %v1672_v8 = vld [vmem:[%s2201_s1 + $0xc0] ss:$16 sps:$4 sm:$0xff]   ;;  %v305_v39 = vunpack.c.0.s8 %v304_v37 }
   0x4   :  { %257 = vmatpush1.bf16.msra.mxu1 %v1654_v5  ;;  %217 = vmatprep.subr.bf16.mxu0 %v1660_v6  ;;  %v1678_v9 = vld [vmem:[%s2201_s1 + $0xc8] ss:$16 sps:$4 sm:$0xff]   ;;  %v1684_v10 = vld [vmem:[%s2201_s1 + $0xa4] ss:$16 sps:$4 sm:$0xff]   ;;  %v1689_v11 = vld [vmem:[%s2201_s1 + $0xac] ss:$16 sps:$4 sm:$0xff]  }
   0x5   :  { %258 = vmatprep.subr.bf16.mxu1 %v1667_v7  ;;  %v1694_v12 = vld [vmem:[%s2201_s1 + $0xa0] ss:$16 sps:$4 sm:$0xff]   ;;  %v1699_v13 = vld [vmem:[%s2201_s1 + $0xa8] ss:$16 sps:$4 sm:$0xff]   ;;  %v1706_v14 = vld [vmem:[%s2201_s1 + $0x84] ss:$16 sps:$4 sm:$0xff]  }
   0x6   :  { %v1713_v15 = vld [vmem:[%s2201_s1 + $0x8c] ss:$16 sps:$4 sm:$0xff]   ;;  %v1718_v16 = vld [vmem:[%s2201_s1 + $0x80] ss:$16 sps:$4 sm:$0xff]   ;;  %v1725_v17 = vld [vmem:[%s2201_s1 + $0x88] ss:$16 sps:$4 sm:$0xff]  }
   0x7   :  { %218 = vmatpush1.bf16.msra.mxu0 %v1672_v8  ;;  %v1730_v18 = vld [vmem:[%s2201_s1 + $0x64] ss:$16 sps:$4 sm:$0xff]   ;;  %v1737_v19 = vld [vmem:[%s2201_s1 + $0x6c] ss:$16 sps:$4 sm:$0xff]   ;;  %v1742_v20 = vld [vmem:[%s2201_s1 + $0x60] ss:$16 sps:$4 sm:$0xff]  }
   0x8   :  { %259 = vmatpush1.bf16.msra.mxu1 %v1678_v9  ;;  %219 = vmatprep.subr.bf16.mxu0 %v1684_v10  ;;  %v1747_v21 = vld [vmem:[%s2201_s1 + $0x68] ss:$16 sps:$4 sm:$0xff]   ;;  %v1754_v22 = vld [vmem:[%s2201_s1 + $0x44] ss:$16 sps:$4 sm:$0xff]   ;;  %v1761_v23 = vld [vmem:[%s2201_s1 + $0x4c] ss:$16 sps:$4 sm:$0xff]  }
   0x9   :  { %260 = vmatprep.subr.bf16.mxu1 %v1689_v11  ;;  %v1768_v24 = vld [vmem:[%s2201_s1 + $0x40] ss:$16 sps:$4 sm:$0xff]   ;;  %v1773_v25 = vld [vmem:[%s2201_s1 + $0x48] ss:$16 sps:$4 sm:$0xff]   ;;  %v1780_v26 = vld [vmem:[%s2201_s1 + $0x24] ss:$16 sps:$4 sm:$0xff]  }
   0xa   :  { %v1785_v27 = vld [vmem:[%s2201_s1 + $0x2c] ss:$16 sps:$4 sm:$0xff]   ;;  %v1792_v28 = vld [vmem:[%s2201_s1 + $0x20] ss:$16 sps:$4 sm:$0xff]   ;;  %v1797_v29 = vld [vmem:[%s2201_s1 + $0x28] ss:$16 sps:$4 sm:$0xff]  }
   0xb   :  { %220 = vmatpush1.bf16.msra.mxu0 %v1694_v12  ;;  %v1804_v30 = vld [vmem:[%s2201_s1 + $0x4] ss:$16 sps:$4 sm:$0xff]   ;;  %v1809_v31 = vld [vmem:[%s2201_s1 + $0xc] ss:$16 sps:$4 sm:$0xff]   ;;  %v1816_v32 = vld [vmem:[%s2201_s1] ss:$16 sps:$4 sm:$0xff]  }
   0xc   :  { %261 = vmatpush1.bf16.msra.mxu1 %v1699_v13  ;;  %221 = vmatprep.subr.bf16.mxu0 %v1706_v14  ;;  %v1821_v33 = vld [vmem:[%s2201_s1 + $0x8] ss:$16 sps:$4 sm:$0xff]   ;;  %v50_v34 = vld [vmem:[#allocation2] sm:$0x3]  ;;  %v307_v40 = vshrl.u32 %v306_v38, 7 }
   0xd   :  { %262 = vmatprep.subr.bf16.mxu1 %v1713_v15  ;;  %v54_v35 = vpack.c.bf16 %v50_v34, %v50_v34  ;;  %v1868_v45 = vld [vmem:[%s2202_s0] sm:$0xff]  }
   0xe   :  { %v1863_v43 = vsub.s32 %v305_v39, %v307_v40  ;;  %v53_v52 = vunpack.c.l.bf16 %v1868_v45  ;;  %v51_v39 = vld [vmem:[#allocation3] sm:$0x3] }
   0xf   :  { %222 = vmatpush1.bf16.msra.mxu0 %v1718_v16 }
  0x10   :  { %263 = vmatpush1.bf16.msra.mxu1 %v1725_v17  ;;  %223 = vmatprep.subr.bf16.mxu0 %v1730_v18 }
  0x11   :  { %264 = vmatprep.subr.bf16.mxu1 %v1737_v19 }
  0x13   :  { %224 = vmatpush1.bf16.msra.mxu0 %v1742_v20 }
  0x14   :  { %265 = vmatpush1.bf16.msra.mxu1 %v1747_v21  ;;  %225 = vmatprep.subr.bf16.mxu0 %v1754_v22 }
  0x15   :  { %266 = vmatprep.subr.bf16.mxu1 %v1761_v23 }
  0x17   :  { %226 = vmatpush1.bf16.msra.mxu0 %v1768_v24 }
  0x18   :  { %267 = vmatpush1.bf16.msra.mxu1 %v1773_v25  ;;  %227 = vmatprep.subr.bf16.mxu0 %v1780_v26 }
  0x19   :  { %268 = vmatprep.subr.bf16.mxu1 %v1785_v27 }
  0x1b   :  { %228 = vmatpush1.bf16.msra.mxu0 %v1792_v28 }
  0x1c   :  { %269 = vmatpush1.bf16.msra.mxu1 %v1797_v29  ;;  %229 = vmatprep.subr.bf16.mxu0 %v1804_v30 }
  0x1d   :  { %270 = vmatprep.subr.bf16.mxu1 %v1809_v31 }
  0x1f   :  { %230 = vmatpush1.bf16.msra.mxu0 %v1816_v32 }
  0x20   :  { %271 = vmatpush1.bf16.msra.mxu1 %v1821_v33  ;;  %355 = vmatprep.subr.bf16.mxu0 %v1636_v0 }
  0x21   :  { %396 = vmatprep.subr.bf16.mxu1 %v1643_v3 }
  0x22   :  { %248 = vmatmul.mubr.bf16.vlgmr.msra.gmra.mxu0 %v54_v35 }
  0x23   :  { %289 = vmatmul.mubr.bf16.vlgmr.msra.gmra.mxu1 %v54_v35  ;;  %356 = vmatpush1.bf16.msra.mxu0 %v1649_v4 }
  0x24   :  { %397 = vmatpush1.bf16.msra.mxu1 %v1654_v5  ;;  %357 = vmatprep.subr.bf16.mxu0 %v1660_v6 }
  0x25   :  { %398 = vmatprep.subr.bf16.mxu1 %v1667_v7  ;;  %387 = vmatprep.mubr.bf16.mxu0 %v1615_v1 }
  0x26   :  { %428 = vmatprep.mubr.bf16.mxu1 %v1615_v1 }
  0x27   :  { %358 = vmatpush1.bf16.msra.mxu0 %v1672_v8 }
  0x28   :  { %399 = vmatpush1.bf16.msra.mxu1 %v1678_v9  ;;  %359 = vmatprep.subr.bf16.mxu0 %v1684_v10 }
  0x29   :  { %400 = vmatprep.subr.bf16.mxu1 %v1689_v11 }
  0x2b   :  { %360 = vmatpush1.bf16.msra.mxu0 %v1694_v12 }
  0x2c   :  { %401 = vmatpush1.bf16.msra.mxu1 %v1699_v13  ;;  %361 = vmatprep.subr.bf16.mxu0 %v1706_v14 }
  0x2d   :  { %402 = vmatprep.subr.bf16.mxu1 %v1713_v15 }
  0x2f   :  { %362 = vmatpush1.bf16.msra.mxu0 %v1718_v16 }
  0x30   :  { %403 = vmatpush1.bf16.msra.mxu1 %v1725_v17  ;;  %363 = vmatprep.subr.bf16.mxu0 %v1730_v18 }
  0x31   :  { %404 = vmatprep.subr.bf16.mxu1 %v1737_v19 }
  0x33   :  { %364 = vmatpush1.bf16.msra.mxu0 %v1742_v20 }
  0x34   :  { %405 = vmatpush1.bf16.msra.mxu1 %v1747_v21  ;;  %365 = vmatprep.subr.bf16.mxu0 %v1754_v22 }
  0x35   :  { %406 = vmatprep.subr.bf16.mxu1 %v1761_v23 }
  0x37   :  { %366 = vmatpush1.bf16.msra.mxu0 %v1768_v24 }
  0x38   :  { %407 = vmatpush1.bf16.msra.mxu1 %v1773_v25  ;;  %367 = vmatprep.subr.bf16.mxu0 %v1780_v26 }
  0x39   :  { %408 = vmatprep.subr.bf16.mxu1 %v1785_v27 }
  0x3b   :  { %368 = vmatpush1.bf16.msra.mxu0 %v1792_v28 }
  0x3c   :  { %409 = vmatpush1.bf16.msra.mxu1 %v1797_v29  ;;  %369 = vmatprep.subr.bf16.mxu0 %v1804_v30 }
  0x3d   :  { %410 = vmatprep.subr.bf16.mxu1 %v1809_v31 }
  0x3f   :  { %370 = vmatpush1.bf16.msra.mxu0 %v1816_v32 }
  0x40   :  { %411 = vmatpush1.bf16.msra.mxu1 %v1821_v33  ;;  %495 = vmatprep.subr.bf16.mxu0 %v1636_v0 }
  0x41   :  { %536 = vmatprep.subr.bf16.mxu1 %v1643_v3 }
  0xe2   :  { %v249_v41 = vpop.f32.mrf.mxu0 }
  0xe3   :  { %v290_v42 = vpop.f32.mrf.mxu1 }
  0xe4   :  { %v251_v44 = vpop.f32.mrf.mxu0 }
  0xe5   :  { %v292_v46 = vpop.f32.mrf.mxu1  ;;  %v301_v47 = vcombine.low %v249_v41, %v251_v44 }
  0xe6   :  { %v302_v48 = vcombine.low %v290_v42, %v292_v46  ;;  %v253_v49 = vpop.f32.mrf.mxu0 }
  0xe7   :  { %v294_v50 = vpop.f32.mrf.mxu1  ;;  %v309_v51 = vrot.slane %v301_v47, %v1863_v43 }
  0xe8   :  { %v316_v53 = vrot.slane %v302_v48, %v1863_v43  ;;  %v254_v54 = vpop.f32.mrf.mxu0 }
  0xe9   :  { %v295_v55 = vpop.f32.mrf.mxu1 }
  0xea   :  { %v317_v56 = vcombine.low %v309_v51, %v316_v53 }
  0xec   :  { %v319_v57 = vadd.f32 %v317_v56, %v53_v52 }
  0xee   :  { %v1373_v58 = vmul.f32 -1.442695, %v319_v57  ;;  %v327_v59 = vrot.slane %v319_v57, 2  ;;  %v338_v61 = vrot.slane %v319_v57, 6  ;;  %v335_v2 = vrot.slane %v319_v57, 4 }
  0xf0   :  { %1455 = vpow2.f32 %v1373_v58  ;;  %v1374_v60 = vmul.f32 -1.442695, %v327_v59  ;;  %v1375_v62 = vmul.f32 -1.442695, %v338_v61  ;;  %v353_v61 = vunpack.c.h.bf16 %v1868_v45 }
  0xf2   :  { %1457 = vpow2.f32 %v1374_v60 }
  0xf3   :  { %1459 = vpow2.f32 %v1375_v62 }
  0xfd   :  { %v1456_v63 = vpop.eup %1455 }
  0xfe   :  { %v323_v34 = vadd.f32 1.0, %v1456_v63 }
  0xff   :  { %v1458_v35 = vpop.eup %1457 }
 0x100   :  { %1461 = vrcp.f32 %v323_v34  ;;  %v332_v36 = vadd.f32 1.0, %v1458_v35  ;;  %v1460_v37 = vpop.eup %1459 }
 0x101   :  { %1463 = vtanh.f32 %v335_v2  ;;  %v343_v42 = vadd.f32 1.0, %v1460_v37 }
 0x102   :  { %1465 = vrcp.f32 %v332_v36 }
 0x103   :  { %1467 = vrcp.f32 %v343_v42 }
 0x10d   :  { %v1462_v38 = vpop.eup %1461 }
 0x10e   :  { %v1464_v40 = vpop.eup %1463 }
 0x10f   :  { %v1466_v41 = vpop.eup %1465  ;;  %v347_v46 = vmul.f32 %v1464_v40, %v1462_v38 }
 0x110   :  { %v346_v44 = vmul.f32 %v1466_v41, %v51_v39  ;;  %v1468_v48 = vpop.eup %1467 }
 0x112   :  { %v1873_v47 = vadd.f32 %v347_v46, %v346_v44 }
 0x114   :  { %1469 = vtanh.f32 %v1873_v47 }
 0x121   :  { %v1470_v49 = vpop.eup %1469 }
 0x122   :  { %v350_v50 = vmul.f32 %v1470_v49, %v1468_v48 }
 0x124   :  { %v354_v51 = vpack.c.bf16 %v350_v50, %v350_v50 }
 0x126   :  { %388 = vmatmul.mubr.bf16.vlgmr.msra.gmra.mxu0 %v354_v51  ;;  %429 = vmatmul.mubr.bf16.vlgmr.msra.gmra.mxu1 %v354_v51 }
 0x127   :  { %496 = vmatpush1.bf16.msra.mxu0 %v1649_v4  ;;  %537 = vmatpush1.bf16.msra.mxu1 %v1654_v5 }
 0x128   :  { %497 = vmatprep.subr.bf16.mxu0 %v1660_v6  ;;  %538 = vmatprep.subr.bf16.mxu1 %v1667_v7 }
 0x129   :  { %527 = vmatprep.mubr.bf16.mxu0 %v1615_v1  ;;  %568 = vmatprep.mubr.bf16.mxu1 %v1615_v1 }
 0x12b   :  { %498 = vmatpush1.bf16.msra.mxu0 %v1672_v8  ;;  %539 = vmatpush1.bf16.msra.mxu1 %v1678_v9 }
 0x12c   :  { %499 = vmatprep.subr.bf16.mxu0 %v1684_v10  ;;  %540 = vmatprep.subr.bf16.mxu1 %v1689_v11 }
 0x12f   :  { %500 = vmatpush1.bf16.msra.mxu0 %v1694_v12  ;;  %541 = vmatpush1.bf16.msra.mxu1 %v1699_v13 }
 0x130   :  { %501 = vmatprep.subr.bf16.mxu0 %v1706_v14  ;;  %542 = vmatprep.subr.bf16.mxu1 %v1713_v15 }
 0x133   :  { %502 = vmatpush1.bf16.msra.mxu0 %v1718_v16  ;;  %543 = vmatpush1.bf16.msra.mxu1 %v1725_v17 }
 0x134   :  { %503 = vmatprep.subr.bf16.mxu0 %v1730_v18  ;;  %544 = vmatprep.subr.bf16.mxu1 %v1737_v19 }
 0x137   :  { %504 = vmatpush1.bf16.msra.mxu0 %v1742_v20  ;;  %545 = vmatpush1.bf16.msra.mxu1 %v1747_v21 }
 0x138   :  { %505 = vmatprep.subr.bf16.mxu0 %v1754_v22  ;;  %546 = vmatprep.subr.bf16.mxu1 %v1761_v23 }
 0x13b   :  { %506 = vmatpush1.bf16.msra.mxu0 %v1768_v24  ;;  %547 = vmatpush1.bf16.msra.mxu1 %v1773_v25 }
 0x13c   :  { %507 = vmatprep.subr.bf16.mxu0 %v1780_v26  ;;  %548 = vmatprep.subr.bf16.mxu1 %v1785_v27 }
 0x13f   :  { %508 = vmatpush1.bf16.msra.mxu0 %v1792_v28  ;;  %549 = vmatpush1.bf16.msra.mxu1 %v1797_v29 }
 0x140   :  { %509 = vmatprep.subr.bf16.mxu0 %v1804_v30  ;;  %550 = vmatprep.subr.bf16.mxu1 %v1809_v31 }
 0x143   :  { %510 = vmatpush1.bf16.msra.mxu0 %v1816_v32  ;;  %551 = vmatpush1.bf16.msra.mxu1 %v1821_v33 }
 0x144   :  { %635 = vmatprep.subr.bf16.mxu0 %v1636_v0  ;;  %676 = vmatprep.subr.bf16.mxu1 %v1643_v3 }
 0x1e6   :  { %v389_v52 = vpop.f32.mrf.mxu0  ;;  %v430_v53 = vpop.f32.mrf.mxu1 }
 0x1e8   :  { %v391_v54 = vpop.f32.mrf.mxu0  ;;  %v432_v55 = vpop.f32.mrf.mxu1 }
 0x1e9   :  { %v441_v56 = vcombine.low %v389_v52, %v391_v54  ;;  %v442_v57 = vcombine.low %v430_v53, %v432_v55 }
 0x1ea   :  { %v393_v58 = vpop.f32.mrf.mxu0  ;;  %v434_v59 = vpop.f32.mrf.mxu1 }
 0x1eb   :  { %v449_v60 = vrot.slane %v441_v56, %v1863_v43  ;;  %v456_v62 = vrot.slane %v442_v57, %v1863_v43 }
 0x1ec   :  { %v394_v63 = vpop.f32.mrf.mxu0  ;;  %v435_v2 = vpop.f32.mrf.mxu1 }
 0x1ed   :  { %v457_v34 = vcombine.low %v449_v60, %v456_v62  ;;  %v1954_v62 = vld [vmem:[%s2202_s0 + $0x8] sm:$0xff]  }
 0x1ef   :  { %v459_v35 = vadd.f32 %v457_v34, %v353_v61 }
 0x1f1   :  { %v1377_v36 = vmul.f32 -1.442695, %v459_v35  ;;  %v467_v37 = vrot.slane %v459_v35, 2  ;;  %v478_v39 = vrot.slane %v459_v35, 6  ;;  %v475_v42 = vrot.slane %v459_v35, 4 }
 0x1f3   :  { %1471 = vpow2.f32 %v1377_v36  ;;  %v1378_v38 = vmul.f32 -1.442695, %v467_v37  ;;  %v1379_v40 = vmul.f32 -1.442695, %v478_v39 }
 0x1f5   :  { %1473 = vpow2.f32 %v1378_v38  ;;  %v493_v38 = vunpack.c.l.bf16 %v1954_v62 }
 0x1f6   :  { %1475 = vpow2.f32 %v1379_v40 }
 0x200   :  { %v1472_v41 = vpop.eup %1471 }
 0x201   :  { %v463_v44 = vadd.f32 1.0, %v1472_v41 }
 0x202   :  { %v1474_v46 = vpop.eup %1473 }
 0x203   :  { %1477 = vrcp.f32 %v463_v44  ;;  %v472_v45 = vadd.f32 1.0, %v1474_v46  ;;  %v1476_v48 = vpop.eup %1475 }
 0x204   :  { %1479 = vtanh.f32 %v475_v42  ;;  %v483_v52 = vadd.f32 1.0, %v1476_v48 }
 0x205   :  { %1481 = vrcp.f32 %v472_v45 }
 0x206   :  { %1483 = vrcp.f32 %v483_v52 }
 0x210   :  { %v1478_v49 = vpop.eup %1477 }
 0x211   :  { %v1480_v50 = vpop.eup %1479 }
 0x212   :  { %v1482_v51 = vpop.eup %1481  ;;  %v487_v54 = vmul.f32 %v1480_v50, %v1478_v49 }
 0x213   :  { %v486_v53 = vmul.f32 %v1482_v51, %v1873_v47  ;;  %v1484_v56 = vpop.eup %1483 }
 0x215   :  { %v1914_v55 = vadd.f32 %v487_v54, %v486_v53 }
 0x217   :  { %1485 = vtanh.f32 %v1914_v55 }
 0x224   :  { %v1486_v57 = vpop.eup %1485 }
 0x225   :  { %v490_v58 = vmul.f32 %v1486_v57, %v1484_v56 }
 0x227   :  { %v494_v59 = vpack.c.bf16 %v490_v58, %v490_v58 }
 0x229   :  { %528 = vmatmul.mubr.bf16.vlgmr.msra.gmra.mxu0 %v494_v59  ;;  %569 = vmatmul.mubr.bf16.vlgmr.msra.gmra.mxu1 %v494_v59 }
 0x22a   :  { %636 = vmatpush1.bf16.msra.mxu0 %v1649_v4  ;;  %677 = vmatpush1.bf16.msra.mxu1 %v1654_v5 }
 0x22b   :  { %637 = vmatprep.subr.bf16.mxu0 %v1660_v6  ;;  %678 = vmatprep.subr.bf16.mxu1 %v1667_v7 }
 0x22c   :  { %667 = vmatprep.mubr.bf16.mxu0 %v1615_v1  ;;  %708 = vmatprep.mubr.bf16.mxu1 %v1615_v1 }
 0x22e   :  { %638 = vmatpush1.bf16.msra.mxu0 %v1672_v8  ;;  %679 = vmatpush1.bf16.msra.mxu1 %v1678_v9 }
 0x22f   :  { %639 = vmatprep.subr.bf16.mxu0 %v1684_v10  ;;  %680 = vmatprep.subr.bf16.mxu1 %v1689_v11 }
 0x232   :  { %640 = vmatpush1.bf16.msra.mxu0 %v1694_v12  ;;  %681 = vmatpush1.bf16.msra.mxu1 %v1699_v13 }
 0x233   :  { %641 = vmatprep.subr.bf16.mxu0 %v1706_v14  ;;  %682 = vmatprep.subr.bf16.mxu1 %v1713_v15 }
 0x236   :  { %642 = vmatpush1.bf16.msra.mxu0 %v1718_v16  ;;  %683 = vmatpush1.bf16.msra.mxu1 %v1725_v17 }
 0x237   :  { %643 = vmatprep.subr.bf16.mxu0 %v1730_v18  ;;  %684 = vmatprep.subr.bf16.mxu1 %v1737_v19 }
 0x23a   :  { %644 = vmatpush1.bf16.msra.mxu0 %v1742_v20  ;;  %685 = vmatpush1.bf16.msra.mxu1 %v1747_v21 }
 0x23b   :  { %645 = vmatprep.subr.bf16.mxu0 %v1754_v22  ;;  %686 = vmatprep.subr.bf16.mxu1 %v1761_v23 }
 0x23e   :  { %646 = vmatpush1.bf16.msra.mxu0 %v1768_v24  ;;  %687 = vmatpush1.bf16.msra.mxu1 %v1773_v25 }
 0x23f   :  { %647 = vmatprep.subr.bf16.mxu0 %v1780_v26  ;;  %688 = vmatprep.subr.bf16.mxu1 %v1785_v27 }
 0x242   :  { %648 = vmatpush1.bf16.msra.mxu0 %v1792_v28  ;;  %689 = vmatpush1.bf16.msra.mxu1 %v1797_v29 }
 0x243   :  { %649 = vmatprep.subr.bf16.mxu0 %v1804_v30  ;;  %690 = vmatprep.subr.bf16.mxu1 %v1809_v31 }
 0x246   :  { %650 = vmatpush1.bf16.msra.mxu0 %v1816_v32  ;;  %691 = vmatpush1.bf16.msra.mxu1 %v1821_v33 }
 0x247   :  { %775 = vmatprep.subr.bf16.mxu0 %v1636_v0  ;;  %816 = vmatprep.subr.bf16.mxu1 %v1643_v3 }
 0x2e9   :  { %v529_v47 = vpop.f32.mrf.mxu0  ;;  %v570_v60 = vpop.f32.mrf.mxu1 }
 0x2eb   :  { %v531_v61 = vpop.f32.mrf.mxu0  ;;  %v572_v63 = vpop.f32.mrf.mxu1 }
 0x2ec   :  { %v581_v2 = vcombine.low %v529_v47, %v531_v61  ;;  %v582_v34 = vcombine.low %v570_v60, %v572_v63 }
 0x2ed   :  { %v533_v35 = vpop.f32.mrf.mxu0  ;;  %v574_v36 = vpop.f32.mrf.mxu1 }
 0x2ee   :  { %v589_v37 = vrot.slane %v581_v2, %v1863_v43  ;;  %v596_v39 = vrot.slane %v582_v34, %v1863_v43 }
 0x2ef   :  { %v534_v40 = vpop.f32.mrf.mxu0  ;;  %v575_v41 = vpop.f32.mrf.mxu1 }
 0x2f0   :  { %v597_v42 = vcombine.low %v589_v37, %v596_v39 }
 0x2f2   :  { %v599_v44 = vadd.f32 %v597_v42, %v493_v38 }
 0x2f4   :  { %v1381_v46 = vmul.f32 -1.442695, %v599_v44  ;;  %v607_v45 = vrot.slane %v599_v44, 2  ;;  %v618_v49 = vrot.slane %v599_v44, 6  ;;  %v615_v52 = vrot.slane %v599_v44, 4 }
 0x2f6   :  { %1487 = vpow2.f32 %v1381_v46  ;;  %v1382_v48 = vmul.f32 -1.442695, %v607_v45  ;;  %v1383_v50 = vmul.f32 -1.442695, %v618_v49 }
 0x2f8   :  { %1489 = vpow2.f32 %v1382_v48  ;;  %v633_v48 = vunpack.c.h.bf16 %v1954_v62 }
 0x2f9   :  { %1491 = vpow2.f32 %v1383_v50 }
 0x303   :  { %v1488_v51 = vpop.eup %1487 }
 0x304   :  { %v603_v53 = vadd.f32 1.0, %v1488_v51 }
 0x305   :  { %v1490_v54 = vpop.eup %1489 }
 0x306   :  { %1493 = vrcp.f32 %v603_v53  ;;  %v612_v56 = vadd.f32 1.0, %v1490_v54  ;;  %v1492_v57 = vpop.eup %1491 }
 0x307   :  { %1495 = vtanh.f32 %v615_v52  ;;  %v623_v60 = vadd.f32 1.0, %v1492_v57 }
 0x308   :  { %1497 = vrcp.f32 %v612_v56 }
 0x309   :  { %1499 = vrcp.f32 %v623_v60 }
 0x313   :  { %v1494_v58 = vpop.eup %1493 }
 0x314   :  { %v1496_v59 = vpop.eup %1495 }
 0x315   :  { %v1498_v47 = vpop.eup %1497  ;;  %v627_v63 = vmul.f32 %v1496_v59, %v1494_v58 }
 0x316   :  { %v626_v61 = vmul.f32 %v1498_v47, %v1914_v55  ;;  %v1500_v34 = vpop.eup %1499 }
 0x318   :  { %v1960_v2 = vadd.f32 %v627_v63, %v626_v61 }
 0x31a   :  { %1501 = vtanh.f32 %v1960_v2 }
 0x327   :  { %v1502_v35 = vpop.eup %1501 }
 0x328   :  { %v630_v36 = vmul.f32 %v1502_v35, %v1500_v34 }
 0x32a   :  { %v634_v37 = vpack.c.bf16 %v630_v36, %v630_v36 }
 0x32c   :  { %668 = vmatmul.mubr.bf16.vlgmr.msra.gmra.mxu0 %v634_v37  ;;  %709 = vmatmul.mubr.bf16.vlgmr.msra.gmra.mxu1 %v634_v37 }
 0x32d   :  { %776 = vmatpush1.bf16.msra.mxu0 %v1649_v4  ;;  %817 = vmatpush1.bf16.msra.mxu1 %v1654_v5 }
 0x32e   :  { %777 = vmatprep.subr.bf16.mxu0 %v1660_v6  ;;  %818 = vmatprep.subr.bf16.mxu1 %v1667_v7 }
 0x32f   :  { %807 = vmatprep.mubr.bf16.mxu0 %v1615_v1  ;;  %848 = vmatprep.mubr.bf16.mxu1 %v1615_v1 }
 0x331   :  { %778 = vmatpush1.bf16.msra.mxu0 %v1672_v8  ;;  %819 = vmatpush1.bf16.msra.mxu1 %v1678_v9 }
 0x332   :  { %779 = vmatprep.subr.bf16.mxu0 %v1684_v10  ;;  %820 = vmatprep.subr.bf16.mxu1 %v1689_v11 }
 0x335   :  { %780 = vmatpush1.bf16.msra.mxu0 %v1694_v12  ;;  %821 = vmatpush1.bf16.msra.mxu1 %v1699_v13 }
 0x336   :  { %781 = vmatprep.subr.bf16.mxu0 %v1706_v14  ;;  %822 = vmatprep.subr.bf16.mxu1 %v1713_v15 }
 0x339   :  { %782 = vmatpush1.bf16.msra.mxu0 %v1718_v16  ;;  %823 = vmatpush1.bf16.msra.mxu1 %v1725_v17 }
 0x33a   :  { %783 = vmatprep.subr.bf16.mxu0 %v1730_v18  ;;  %824 = vmatprep.subr.bf16.mxu1 %v1737_v19 }
 0x33d   :  { %784 = vmatpush1.bf16.msra.mxu0 %v1742_v20  ;;  %825 = vmatpush1.bf16.msra.mxu1 %v1747_v21 }
 0x33e   :  { %785 = vmatprep.subr.bf16.mxu0 %v1754_v22  ;;  %826 = vmatprep.subr.bf16.mxu1 %v1761_v23 }
 0x341   :  { %786 = vmatpush1.bf16.msra.mxu0 %v1768_v24  ;;  %827 = vmatpush1.bf16.msra.mxu1 %v1773_v25 }
 0x342   :  { %787 = vmatprep.subr.bf16.mxu0 %v1780_v26  ;;  %828 = vmatprep.subr.bf16.mxu1 %v1785_v27 }
 0x345   :  { %788 = vmatpush1.bf16.msra.mxu0 %v1792_v28  ;;  %829 = vmatpush1.bf16.msra.mxu1 %v1797_v29 }
 0x346   :  { %789 = vmatprep.subr.bf16.mxu0 %v1804_v30  ;;  %830 = vmatprep.subr.bf16.mxu1 %v1809_v31 }
 0x349   :  { %790 = vmatpush1.bf16.msra.mxu0 %v1816_v32  ;;  %831 = vmatpush1.bf16.msra.mxu1 %v1821_v33 }
 0x34a   :  { %915 = vmatprep.subr.bf16.mxu0 %v1636_v0  ;;  %956 = vmatprep.subr.bf16.mxu1 %v1643_v3 }
 0x3ec   :  { %v669_v55 = vpop.f32.mrf.mxu0  ;;  %v710_v38 = vpop.f32.mrf.mxu1 }
 0x3ee   :  { %v671_v39 = vpop.f32.mrf.mxu0  ;;  %v712_v40 = vpop.f32.mrf.mxu1 }
 0x3ef   :  { %v721_v41 = vcombine.low %v669_v55, %v671_v39  ;;  %v722_v42 = vcombine.low %v710_v38, %v712_v40 }
 0x3f0   :  { %v673_v44 = vpop.f32.mrf.mxu0  ;;  %v714_v46 = vpop.f32.mrf.mxu1 }
 0x3f1   :  { %v729_v45 = vrot.slane %v721_v41, %v1863_v43  ;;  %v736_v49 = vrot.slane %v722_v42, %v1863_v43 }
 0x3f2   :  { %v674_v50 = vpop.f32.mrf.mxu0  ;;  %v715_v51 = vpop.f32.mrf.mxu1 }
 0x3f3   :  { %v737_v52 = vcombine.low %v729_v45, %v736_v49  ;;  %v2041_v49 = vld [vmem:[%s2202_s0 + $0x10] sm:$0xff]  }
 0x3f5   :  { %v739_v53 = vadd.f32 %v737_v52, %v633_v48 }
 0x3f7   :  { %v1385_v54 = vmul.f32 -1.442695, %v739_v53  ;;  %v747_v56 = vrot.slane %v739_v53, 2  ;;  %v758_v58 = vrot.slane %v739_v53, 6  ;;  %v755_v60 = vrot.slane %v739_v53, 4 }
 0x3f9   :  { %1503 = vpow2.f32 %v1385_v54  ;;  %v1386_v57 = vmul.f32 -1.442695, %v747_v56  ;;  %v1387_v59 = vmul.f32 -1.442695, %v758_v58 }
 0x3fb   :  { %1505 = vpow2.f32 %v1386_v57  ;;  %v773_v57 = vunpack.c.l.bf16 %v2041_v49 }
 0x3fc   :  { %1507 = vpow2.f32 %v1387_v59 }
 0x406   :  { %v1504_v47 = vpop.eup %1503 }
 0x407   :  { %v743_v61 = vadd.f32 1.0, %v1504_v47 }
 0x408   :  { %v1506_v63 = vpop.eup %1505 }
 0x409   :  { %1509 = vrcp.f32 %v743_v61  ;;  %v752_v62 = vadd.f32 1.0, %v1506_v63  ;;  %v1508_v34 = vpop.eup %1507 }
 0x40a   :  { %1511 = vtanh.f32 %v755_v60  ;;  %v763_v55 = vadd.f32 1.0, %v1508_v34 }
 0x40b   :  { %1513 = vrcp.f32 %v752_v62 }
 0x40c   :  { %1515 = vrcp.f32 %v763_v55 }
 0x416   :  { %v1510_v35 = vpop.eup %1509 }
 0x417   :  { %v1512_v36 = vpop.eup %1511 }
 0x418   :  { %v1514_v37 = vpop.eup %1513  ;;  %v767_v39 = vmul.f32 %v1512_v36, %v1510_v35 }
 0x419   :  { %v766_v38 = vmul.f32 %v1514_v37, %v1960_v2  ;;  %v1516_v41 = vpop.eup %1515 }
 0x41b   :  { %v2001_v40 = vadd.f32 %v767_v39, %v766_v38 }
 0x41d   :  { %1517 = vtanh.f32 %v2001_v40 }
 0x42a   :  { %v1518_v42 = vpop.eup %1517 }
 0x42b   :  { %v770_v44 = vmul.f32 %v1518_v42, %v1516_v41 }
 0x42d   :  { %v774_v46 = vpack.c.bf16 %v770_v44, %v770_v44 }
 0x42f   :  { %808 = vmatmul.mubr.bf16.vlgmr.msra.gmra.mxu0 %v774_v46  ;;  %849 = vmatmul.mubr.bf16.vlgmr.msra.gmra.mxu1 %v774_v46 }
 0x430   :  { %916 = vmatpush1.bf16.msra.mxu0 %v1649_v4  ;;  %957 = vmatpush1.bf16.msra.mxu1 %v1654_v5 }
 0x431   :  { %917 = vmatprep.subr.bf16.mxu0 %v1660_v6  ;;  %958 = vmatprep.subr.bf16.mxu1 %v1667_v7 }
 0x432   :  { %947 = vmatprep.mubr.bf16.mxu0 %v1615_v1  ;;  %988 = vmatprep.mubr.bf16.mxu1 %v1615_v1 }
 0x434   :  { %918 = vmatpush1.bf16.msra.mxu0 %v1672_v8  ;;  %959 = vmatpush1.bf16.msra.mxu1 %v1678_v9 }
 0x435   :  { %919 = vmatprep.subr.bf16.mxu0 %v1684_v10  ;;  %960 = vmatprep.subr.bf16.mxu1 %v1689_v11 }
 0x438   :  { %920 = vmatpush1.bf16.msra.mxu0 %v1694_v12  ;;  %961 = vmatpush1.bf16.msra.mxu1 %v1699_v13 }
 0x439   :  { %921 = vmatprep.subr.bf16.mxu0 %v1706_v14  ;;  %962 = vmatprep.subr.bf16.mxu1 %v1713_v15 }
 0x43c   :  { %922 = vmatpush1.bf16.msra.mxu0 %v1718_v16  ;;  %963 = vmatpush1.bf16.msra.mxu1 %v1725_v17 }
 0x43d   :  { %923 = vmatprep.subr.bf16.mxu0 %v1730_v18  ;;  %964 = vmatprep.subr.bf16.mxu1 %v1737_v19 }
 0x440   :  { %924 = vmatpush1.bf16.msra.mxu0 %v1742_v20  ;;  %965 = vmatpush1.bf16.msra.mxu1 %v1747_v21 }
 0x441   :  { %925 = vmatprep.subr.bf16.mxu0 %v1754_v22  ;;  %966 = vmatprep.subr.bf16.mxu1 %v1761_v23 }
 0x444   :  { %926 = vmatpush1.bf16.msra.mxu0 %v1768_v24  ;;  %967 = vmatpush1.bf16.msra.mxu1 %v1773_v25 }
 0x445   :  { %927 = vmatprep.subr.bf16.mxu0 %v1780_v26  ;;  %968 = vmatprep.subr.bf16.mxu1 %v1785_v27 }
 0x448   :  { %928 = vmatpush1.bf16.msra.mxu0 %v1792_v28  ;;  %969 = vmatpush1.bf16.msra.mxu1 %v1797_v29 }
 0x449   :  { %929 = vmatprep.subr.bf16.mxu0 %v1804_v30  ;;  %970 = vmatprep.subr.bf16.mxu1 %v1809_v31 }
 0x44c   :  { %930 = vmatpush1.bf16.msra.mxu0 %v1816_v32  ;;  %971 = vmatpush1.bf16.msra.mxu1 %v1821_v33 }
 0x44d   :  { %1055 = vmatprep.subr.bf16.mxu0 %v1636_v0  ;;  %1096 = vmatprep.subr.bf16.mxu1 %v1643_v3 }
 0x4ef   :  { %v809_v2 = vpop.f32.mrf.mxu0  ;;  %v850_v45 = vpop.f32.mrf.mxu1 }
 0x4f1   :  { %v811_v48 = vpop.f32.mrf.mxu0  ;;  %v852_v50 = vpop.f32.mrf.mxu1 }
 0x4f2   :  { %v861_v51 = vcombine.low %v809_v2, %v811_v48  ;;  %v862_v52 = vcombine.low %v850_v45, %v852_v50 }
 0x4f3   :  { %v813_v53 = vpop.f32.mrf.mxu0  ;;  %v854_v54 = vpop.f32.mrf.mxu1 }
 0x4f4   :  { %v869_v56 = vrot.slane %v861_v51, %v1863_v43  ;;  %v876_v0 = vrot.slane %v862_v52, %v1863_v43 }
 0x4f5   :  { %v814_v3 = vpop.f32.mrf.mxu0  ;;  %v855_v58 = vpop.f32.mrf.mxu1 }
 0x4f6   :  { %v877_v59 = vcombine.low %v869_v56, %v876_v0 }
 0x4f8   :  { %v879_v47 = vadd.f32 %v877_v59, %v773_v57 }
 0x4fa   :  { %v1389_v60 = vmul.f32 -1.442695, %v879_v47  ;;  %v887_v61 = vrot.slane %v879_v47, 2  ;;  %v898_v62 = vrot.slane %v879_v47, 6  ;;  %v895_v36 = vrot.slane %v879_v47, 4 }
 0x4fb   :  { %v1585_v47 = vld [vmem:[%s2201_s1 + $0xe0] ss:$16 sps:$4 sm:$0xff]  }
 0x4fc   :  { %1519 = vpow2.f32 %v1389_v60  ;;  %v1390_v63 = vmul.f32 -1.442695, %v887_v61  ;;  %v1391_v34 = vmul.f32 -1.442695, %v898_v62  ;;  %v1586_v60 = vld [vmem:[%s2201_s1 + $0xe8] ss:$16 sps:$4 sm:$0xff]  }
 0x4fd   :  { %v1587_v61 = vld [vmem:[%s2201_s1 + $0xc4] ss:$16 sps:$4 sm:$0xff]   ;;  %v1589_v62 = vld [vmem:[%s2201_s1 + $0xc0] ss:$16 sps:$4 sm:$0xff]  }
 0x4fe   :  { %1521 = vpow2.f32 %v1390_v63  ;;  %v1588_v63 = vld [vmem:[%s2201_s1 + $0xcc] ss:$16 sps:$4 sm:$0xff]  }
 0x4ff   :  { %1523 = vpow2.f32 %v1391_v34  ;;  %v1590_v34 = vld [vmem:[%s2201_s1 + $0xc8] ss:$16 sps:$4 sm:$0xff]  }
 0x509   :  { %v1520_v35 = vpop.eup %1519 }
 0x50a   :  { %v883_v37 = vadd.f32 1.0, %v1520_v35  ;;  %v1591_v35 = vld [vmem:[%s2201_s1 + $0xa4] ss:$16 sps:$4 sm:$0xff]  }
 0x50b   :  { %v1522_v55 = vpop.eup %1521 }
 0x50c   :  { %1525 = vrcp.f32 %v883_v37  ;;  %v892_v38 = vadd.f32 1.0, %v1522_v55  ;;  %v1524_v39 = vpop.eup %1523  ;;  %v1594_v37 = vld [vmem:[%s2201_s1 + $0xa8] ss:$16 sps:$4 sm:$0xff]   ;;  %v1595_v55 = vld [vmem:[%s2201_s1 + $0x84] ss:$16 sps:$4 sm:$0xff]  }
 0x50d   :  { %1527 = vtanh.f32 %v895_v36  ;;  %v903_v46 = vadd.f32 1.0, %v1524_v39  ;;  %v1592_v36 = vld [vmem:[%s2201_s1 + $0xac] ss:$16 sps:$4 sm:$0xff]   ;;  %v1597_v39 = vld [vmem:[%s2201_s1 + $0x80] ss:$16 sps:$4 sm:$0xff]  }
 0x50e   :  { %1529 = vrcp.f32 %v892_v38  ;;  %v1596_v38 = vld [vmem:[%s2201_s1 + $0x8c] ss:$16 sps:$4 sm:$0xff]  }
 0x50f   :  { %1531 = vrcp.f32 %v903_v46  ;;  %v1601_v46 = vld [vmem:[%s2201_s1 + $0x60] ss:$16 sps:$4 sm:$0xff]  }
 0x519   :  { %v1526_v41 = vpop.eup %1525 }
 0x51a   :  { %v1528_v42 = vpop.eup %1527 }
 0x51b   :  { %v1530_v44 = vpop.eup %1529  ;;  %v907_v45 = vmul.f32 %v1528_v42, %v1526_v41  ;;  %v1598_v41 = vld [vmem:[%s2201_s1 + $0x88] ss:$16 sps:$4 sm:$0xff]   ;;  %v1599_v42 = vld [vmem:[%s2201_s1 + $0x64] ss:$16 sps:$4 sm:$0xff]  }
 0x51c   :  { %v906_v2 = vmul.f32 %v1530_v44, %v2001_v40  ;;  %v1532_v50 = vpop.eup %1531  ;;  %v1600_v44 = vld [vmem:[%s2201_s1 + $0x6c] ss:$16 sps:$4 sm:$0xff]  }
 0x51e   :  { %v2047_v48 = vadd.f32 %v907_v45, %v906_v2  ;;  %v1602_v2 = vld [vmem:[%s2201_s1 + $0x68] ss:$16 sps:$4 sm:$0xff]   ;;  %v1603_v45 = vld [vmem:[%s2201_s1 + $0x44] ss:$16 sps:$4 sm:$0xff]  }
 0x520   :  { %1533 = vtanh.f32 %v2047_v48 }
 0x52d   :  { %v1534_v51 = vpop.eup %1533 }
 0x52e   :  { %v910_v52 = vmul.f32 %v1534_v51, %v1532_v50  ;;  %v1605_v50 = vld [vmem:[%s2201_s1 + $0x40] ss:$16 sps:$4 sm:$0xff]   ;;  %v1606_v51 = vld [vmem:[%s2201_s1 + $0x48] ss:$16 sps:$4 sm:$0xff]  }
 0x530   :  { %v914_v53 = vpack.c.bf16 %v910_v52, %v910_v52  ;;  %v1607_v52 = vld [vmem:[%s2201_s1 + $0x24] ss:$16 sps:$4 sm:$0xff]  }
 0x532   :  { %948 = vmatmul.mubr.bf16.vlgmr.msra.gmra.mxu0 %v914_v53  ;;  %989 = vmatmul.mubr.bf16.vlgmr.msra.gmra.mxu1 %v914_v53  ;;  %v1608_v53 = vld [vmem:[%s2201_s1 + $0x2c] ss:$16 sps:$4 sm:$0xff]  }
 0x533   :  { %1056 = vmatpush1.bf16.msra.mxu0 %v1649_v4  ;;  %1097 = vmatpush1.bf16.msra.mxu1 %v1654_v5  ;;  %v1583_v4 = vld [vmem:[%s2201_s1 + $0xe4] ss:$16 sps:$4 sm:$0xff]   ;;  %v1584_v5 = vld [vmem:[%s2201_s1 + $0xec] ss:$16 sps:$4 sm:$0xff]  }
 0x534   :  { %1057 = vmatprep.subr.bf16.mxu0 %v1660_v6  ;;  %1098 = vmatprep.subr.bf16.mxu1 %v1667_v7 }
 0x535   :  { %1087 = vmatprep.mubr.bf16.mxu0 %v1615_v1  ;;  %1128 = vmatprep.mubr.bf16.mxu1 %v1615_v1 }
 0x537   :  { %1058 = vmatpush1.bf16.msra.mxu0 %v1672_v8  ;;  %1099 = vmatpush1.bf16.msra.mxu1 %v1678_v9 }
 0x538   :  { %1059 = vmatprep.subr.bf16.mxu0 %v1684_v10  ;;  %1100 = vmatprep.subr.bf16.mxu1 %v1689_v11 }
 0x53b   :  { %1060 = vmatpush1.bf16.msra.mxu0 %v1694_v12  ;;  %1101 = vmatpush1.bf16.msra.mxu1 %v1699_v13 }
 0x53c   :  { %1061 = vmatprep.subr.bf16.mxu0 %v1706_v14  ;;  %1102 = vmatprep.subr.bf16.mxu1 %v1713_v15  ;;  %v913_v15 = vunpack.c.h.bf16 %v2041_v49 }
 0x53f   :  { %1062 = vmatpush1.bf16.msra.mxu0 %v1718_v16  ;;  %1103 = vmatpush1.bf16.msra.mxu1 %v1725_v17 }
 0x540   :  { %1063 = vmatprep.subr.bf16.mxu0 %v1730_v18  ;;  %1104 = vmatprep.subr.bf16.mxu1 %v1737_v19 }
 0x543   :  { %1064 = vmatpush1.bf16.msra.mxu0 %v1742_v20  ;;  %1105 = vmatpush1.bf16.msra.mxu1 %v1747_v21 }
 0x544   :  { %1065 = vmatprep.subr.bf16.mxu0 %v1754_v22  ;;  %1106 = vmatprep.subr.bf16.mxu1 %v1761_v23 }
 0x547   :  { %1066 = vmatpush1.bf16.msra.mxu0 %v1768_v24  ;;  %1107 = vmatpush1.bf16.msra.mxu1 %v1773_v25 }
 0x548   :  { %1067 = vmatprep.subr.bf16.mxu0 %v1780_v26  ;;  %1108 = vmatprep.subr.bf16.mxu1 %v1785_v27 }
 0x54b   :  { %1068 = vmatpush1.bf16.msra.mxu0 %v1792_v28  ;;  %1109 = vmatpush1.bf16.msra.mxu1 %v1797_v29 }
 0x54c   :  { %1069 = vmatprep.subr.bf16.mxu0 %v1804_v30  ;;  %1110 = vmatprep.subr.bf16.mxu1 %v1809_v31 }
 0x54f   :  { %1070 = vmatpush1.bf16.msra.mxu0 %v1816_v32  ;;  %1111 = vmatpush1.bf16.msra.mxu1 %v1821_v33 }
 0x550   :  { %1195 = vmatprep.subr.bf16.mxu0 %v1583_v4  ;;  %1236 = vmatprep.subr.bf16.mxu1 %v1584_v5  ;;  %v1609_v4 = vld [vmem:[%s2201_s1 + $0x20] ss:$16 sps:$4 sm:$0xff]   ;;  %v1610_v5 = vld [vmem:[%s2201_s1 + $0x28] ss:$16 sps:$4 sm:$0xff]  }
 0x5f2   :  { %v949_v6 = vpop.f32.mrf.mxu0  ;;  %v990_v7 = vpop.f32.mrf.mxu1 }
 0x5f4   :  { %v951_v8 = vpop.f32.mrf.mxu0  ;;  %v992_v9 = vpop.f32.mrf.mxu1 }
 0x5f5   :  { %v1001_v10 = vcombine.low %v949_v6, %v951_v8  ;;  %v1002_v11 = vcombine.low %v990_v7, %v992_v9  ;;  %v1611_v6 = vld [vmem:[%s2201_s1 + $0x4] ss:$16 sps:$4 sm:$0xff]   ;;  %v1612_v7 = vld [vmem:[%s2201_s1 + $0xc] ss:$16 sps:$4 sm:$0xff]   ;;  %v1613_v8 = vld [vmem:[%s2201_s1] ss:$16 sps:$4 sm:$0xff]  }
 0x5f6   :  { %v953_v12 = vpop.f32.mrf.mxu0  ;;  %v994_v13 = vpop.f32.mrf.mxu1  ;;  %v1614_v9 = vld [vmem:[%s2201_s1 + $0x8] ss:$16 sps:$4 sm:$0xff]  }
 0x5f7   :  { %v1009_v14 = vrot.slane %v1001_v10, %v1863_v43  ;;  %v1016_v16 = vrot.slane %v1002_v11, %v1863_v43  ;;  %v1396_v13 = vld [vmem:[%s2202_s0 + $0x18] sm:$0xf] }
 0x5f8   :  { %v954_v17 = vpop.f32.mrf.mxu0  ;;  %v995_v18 = vpop.f32.mrf.mxu1 }
 0x5f9   :  { %v1017_v19 = vcombine.low %v1009_v14, %v1016_v16 }
 0x5fb   :  { %v1019_v20 = vadd.f32 %v1017_v19, %v913_v15 }
 0x5fd   :  { %v1393_v21 = vmul.f32 -1.442695, %v1019_v20  ;;  %v1027_v22 = vrot.slane %v1019_v20, 2  ;;  %v1038_v24 = vrot.slane %v1019_v20, 6  ;;  %v1035_v27 = vrot.slane %v1019_v20, 4 }
 0x5fe   :  { %v1053_v20 = vunpack.c.l.bf16 %v1396_v13 }
 0x5ff   :  { %1535 = vpow2.f32 %v1393_v21  ;;  %v1394_v23 = vmul.f32 -1.442695, %v1027_v22  ;;  %v1395_v25 = vmul.f32 -1.442695, %v1038_v24 }
 0x601   :  { %1537 = vpow2.f32 %v1394_v23 }
 0x602   :  { %1539 = vpow2.f32 %v1395_v25 }
 0x60c   :  { %v1536_v26 = vpop.eup %1535 }
 0x60d   :  { %v1023_v28 = vadd.f32 1.0, %v1536_v26 }
 0x60e   :  { %v1538_v29 = vpop.eup %1537 }
 0x60f   :  { %1541 = vrcp.f32 %v1023_v28  ;;  %v1032_v30 = vadd.f32 1.0, %v1538_v29  ;;  %v1540_v31 = vpop.eup %1539 }
 0x610   :  { %1543 = vtanh.f32 %v1035_v27  ;;  %v1043_v49 = vadd.f32 1.0, %v1540_v31 }
 0x611   :  { %1545 = vrcp.f32 %v1032_v30 }
 0x612   :  { %1547 = vrcp.f32 %v1043_v49 }
 0x61c   :  { %v1542_v32 = vpop.eup %1541 }
 0x61d   :  { %v1544_v33 = vpop.eup %1543 }
 0x61e   :  { %v1546_v40 = vpop.eup %1545  ;;  %v1047_v56 = vmul.f32 %v1544_v33, %v1542_v32 }
 0x61f   :  { %v1046_v54 = vmul.f32 %v1546_v40, %v2047_v48  ;;  %v1548_v0 = vpop.eup %1547  ;;  %v1604_v48 = vld [vmem:[%s2201_s1 + $0x4c] ss:$16 sps:$4 sm:$0xff]  }
 0x621   :  { %v2092_v57 = vadd.f32 %v1047_v56, %v1046_v54 }
 0x623   :  { %1549 = vtanh.f32 %v2092_v57 }
 0x630   :  { %v1550_v3 = vpop.eup %1549 }
 0x631   :  { %v1050_v58 = vmul.f32 %v1550_v3, %v1548_v0 }
 0x633   :  { %v1054_v59 = vpack.c.bf16 %v1050_v58, %v1050_v58 }
 0x635   :  { %1088 = vmatmul.mubr.bf16.vlgmr.msra.gmra.mxu0 %v1054_v59  ;;  %1129 = vmatmul.mubr.bf16.vlgmr.msra.gmra.mxu1 %v1054_v59 }
 0x636   :  { %1196 = vmatpush1.bf16.msra.mxu0 %v1585_v47  ;;  %1237 = vmatpush1.bf16.msra.mxu1 %v1586_v60 }
 0x637   :  { %1197 = vmatprep.subr.bf16.mxu0 %v1587_v61  ;;  %1238 = vmatprep.subr.bf16.mxu1 %v1588_v63 }
 0x638   :  { %1227 = vmatprep.mubr.bf16.mxu0 %v1615_v1  ;;  %1268 = vmatprep.mubr.bf16.mxu1 %v1615_v1  ;;  %v1593_v1 = vld [vmem:[%s2201_s1 + $0xa0] ss:$16 sps:$4 sm:$0xff]  }
 0x63a   :  { %1198 = vmatpush1.bf16.msra.mxu0 %v1589_v62  ;;  %1239 = vmatpush1.bf16.msra.mxu1 %v1590_v34 }
 0x63b   :  { %1199 = vmatprep.subr.bf16.mxu0 %v1591_v35  ;;  %1240 = vmatprep.subr.bf16.mxu1 %v1592_v36 }
 0x63e   :  { %1200 = vmatpush1.bf16.msra.mxu0 %v1593_v1  ;;  %1241 = vmatpush1.bf16.msra.mxu1 %v1594_v37  ;;  %v1400_v37 = vld [vmem:[%s2202_s0 + $0x1c] sm:$0xf] }
 0x63f   :  { %1201 = vmatprep.subr.bf16.mxu0 %v1595_v55  ;;  %1242 = vmatprep.subr.bf16.mxu1 %v1596_v38 }
 0x642   :  { %1202 = vmatpush1.bf16.msra.mxu0 %v1597_v39  ;;  %1243 = vmatpush1.bf16.msra.mxu1 %v1598_v41 }
 0x643   :  { %1203 = vmatprep.subr.bf16.mxu0 %v1599_v42  ;;  %1244 = vmatprep.subr.bf16.mxu1 %v1600_v44  ;;  %v1193_v44 = vunpack.c.l.bf16 %v1400_v37 }
 0x646   :  { %1204 = vmatpush1.bf16.msra.mxu0 %v1601_v46  ;;  %1245 = vmatpush1.bf16.msra.mxu1 %v1602_v2 }
 0x647   :  { %1205 = vmatprep.subr.bf16.mxu0 %v1603_v45  ;;  %1246 = vmatprep.subr.bf16.mxu1 %v1604_v48 }
 0x64a   :  { %1206 = vmatpush1.bf16.msra.mxu0 %v1605_v50  ;;  %1247 = vmatpush1.bf16.msra.mxu1 %v1606_v51 }
 0x64b   :  { %1207 = vmatprep.subr.bf16.mxu0 %v1607_v52  ;;  %1248 = vmatprep.subr.bf16.mxu1 %v1608_v53 }
 0x64e   :  { %1208 = vmatpush1.bf16.msra.mxu0 %v1609_v4  ;;  %1249 = vmatpush1.bf16.msra.mxu1 %v1610_v5 }
 0x64f   :  { %1209 = vmatprep.subr.bf16.mxu0 %v1611_v6  ;;  %1250 = vmatprep.subr.bf16.mxu1 %v1612_v7 }
 0x652   :  { %1210 = vmatpush1.bf16.msra.mxu0 %v1613_v8  ;;  %1251 = vmatpush1.bf16.msra.mxu1 %v1614_v9 }
 0x6f5   :  { %v1089_v10 = vpop.f32.mrf.mxu0  ;;  %v1130_v11 = vpop.f32.mrf.mxu1 }
 0x6f7   :  { %v1091_v12 = vpop.f32.mrf.mxu0  ;;  %v1132_v14 = vpop.f32.mrf.mxu1 }
 0x6f8   :  { %v1141_v15 = vcombine.low %v1089_v10, %v1091_v12  ;;  %v1142_v16 = vcombine.low %v1130_v11, %v1132_v14 }
 0x6f9   :  { %v1093_v17 = vpop.f32.mrf.mxu0  ;;  %v1134_v18 = vpop.f32.mrf.mxu1 }
 0x6fa   :  { %v1149_v19 = vrot.slane %v1141_v15, %v1863_v43  ;;  %v1156_v21 = vrot.slane %v1142_v16, %v1863_v43 }
 0x6fb   :  { %v1094_v22 = vpop.f32.mrf.mxu0  ;;  %v1135_v23 = vpop.f32.mrf.mxu1 }
 0x6fc   :  { %v1157_v24 = vcombine.low %v1149_v19, %v1156_v21 }
 0x6fe   :  { %v1159_v25 = vadd.f32 %v1157_v24, %v1053_v20 }
 0x700   :  { %v1397_v26 = vmul.f32 -1.442695, %v1159_v25  ;;  %v1167_v27 = vrot.slane %v1159_v25, 2  ;;  %v1178_v29 = vrot.slane %v1159_v25, 6  ;;  %v1175_v32 = vrot.slane %v1159_v25, 4 }
 0x702   :  { %1551 = vpow2.f32 %v1397_v26  ;;  %v1398_v28 = vmul.f32 -1.442695, %v1167_v27  ;;  %v1399_v30 = vmul.f32 -1.442695, %v1178_v29 }
 0x704   :  { %1553 = vpow2.f32 %v1398_v28 }
 0x705   :  { %1555 = vpow2.f32 %v1399_v30 }
 0x70f   :  { %v1552_v31 = vpop.eup %1551 }
 0x710   :  { %v1163_v33 = vadd.f32 1.0, %v1552_v31 }
 0x711   :  { %v1554_v40 = vpop.eup %1553 }
 0x712   :  { %1557 = vrcp.f32 %v1163_v33  ;;  %v1172_v49 = vadd.f32 1.0, %v1554_v40  ;;  %v1556_v54 = vpop.eup %1555 }
 0x713   :  { %1559 = vtanh.f32 %v1175_v32  ;;  %v1183_v58 = vadd.f32 1.0, %v1556_v54 }
 0x714   :  { %1561 = vrcp.f32 %v1172_v49 }
 0x715   :  { %1563 = vrcp.f32 %v1183_v58 }
 0x71f   :  { %v1558_v56 = vpop.eup %1557 }
 0x720   :  { %v1560_v0 = vpop.eup %1559 }
 0x721   :  { %v1562_v3 = vpop.eup %1561  ;;  %v1187_v47 = vmul.f32 %v1560_v0, %v1558_v56 }
 0x722   :  { %v1186_v59 = vmul.f32 %v1562_v3, %v2092_v57  ;;  %v1564_v61 = vpop.eup %1563 }
 0x724   :  { %v1188_v60 = vadd.f32 %v1187_v47, %v1186_v59 }
 0x726   :  { %1565 = vtanh.f32 %v1188_v60 }
 0x733   :  { %v1566_v63 = vpop.eup %1565 }
 0x734   :  { %v1190_v62 = vmul.f32 %v1566_v63, %v1564_v61 }
 0x736   :  { %v1194_v34 = vpack.c.bf16 %v1190_v62, %v1190_v62 }
 0x738   :  { %1228 = vmatmul.mubr.bf16.vlgmr.msra.gmra.mxu0 %v1194_v34  ;;  %1269 = vmatmul.mubr.bf16.vlgmr.msra.gmra.mxu1 %v1194_v34 }
 0x7f8   :  { %v1229_v35 = vpop.f32.mrf.mxu0  ;;  %v1270_v36 = vpop.f32.mrf.mxu1 }
 0x7fa   :  { %v1231_v1 = vpop.f32.mrf.mxu0  ;;  %v1272_v55 = vpop.f32.mrf.mxu1 }
 0x7fb   :  { %v1281_v38 = vcombine.low %v1229_v35, %v1231_v1  ;;  %v1282_v57 = vcombine.low %v1270_v36, %v1272_v55 }
 0x7fc   :  { %v1233_v39 = vpop.f32.mrf.mxu0  ;;  %v1274_v41 = vpop.f32.mrf.mxu1 }
 0x7fd   :  { %v1289_v42 = vrot.slane %v1281_v38, %v1863_v43  ;;  %v1296_v46 = vrot.slane %v1282_v57, %v1863_v43 }
 0x7fe   :  { %v1234_v2 = vpop.f32.mrf.mxu0  ;;  %v1275_v45 = vpop.f32.mrf.mxu1 }
 0x7ff   :  { %v1297_v48 = vcombine.low %v1289_v42, %v1296_v46 }
 0x801   :  { %v1299_v50 = vadd.f32 %v1297_v48, %v1193_v44 }
 0x803   :  { %v1401_v51 = vmul.f32 -1.442695, %v1299_v50  ;;  %v1307_v52 = vrot.slane %v1299_v50, 2  ;;  %v1318_v4 = vrot.slane %v1299_v50, 6  ;;  %v1315_v7 = vrot.slane %v1299_v50, 4 }
 0x805   :  { %1567 = vpow2.f32 %v1401_v51  ;;  %v1402_v53 = vmul.f32 -1.442695, %v1307_v52  ;;  %v1403_v5 = vmul.f32 -1.442695, %v1318_v4 }
 0x807   :  { %1569 = vpow2.f32 %v1402_v53 }
 0x808   :  { %1571 = vpow2.f32 %v1403_v5 }
 0x812   :  { %v1568_v6 = vpop.eup %1567 }
 0x813   :  { %v1303_v8 = vadd.f32 1.0, %v1568_v6 }
 0x814   :  { %v1570_v9 = vpop.eup %1569 }
 0x815   :  { %1573 = vrcp.f32 %v1303_v8  ;;  %v1312_v10 = vadd.f32 1.0, %v1570_v9  ;;  %v1572_v43 = vpop.eup %1571 }
 0x816   :  { %1575 = vtanh.f32 %v1315_v7  ;;  %v1323_v14 = vadd.f32 1.0, %v1572_v43 }
 0x817   :  { %1577 = vrcp.f32 %v1312_v10 }
 0x818   :  { %1579 = vrcp.f32 %v1323_v14 }
 0x822   :  { %v1574_v11 = vpop.eup %1573 }
 0x823   :  { %v1576_v12 = vpop.eup %1575 }
 0x824   :  { %v1578_v13 = vpop.eup %1577  ;;  %v1327_v16 = vmul.f32 %v1576_v12, %v1574_v11 }
 0x825   :  { %v1326_v15 = vmul.f32 %v1578_v13, %v1188_v60  ;;  %v1580_v18 = vpop.eup %1579 }
 0x827   :  { %v1328_v17 = vadd.f32 %v1327_v16, %v1326_v15 }
 0x829   :  { %1581 = vtanh.f32 %v1328_v17  ;;  %1332 = vst [vmem:[#allocation3] sm:$0x3] %v1328_v17 }
 0x836   :  { %v1582_v19 = vpop.eup %1581 }
 0x837   :  { %v1330_v20 = vmul.f32 %v1582_v19, %v1580_v18 }
 0x839   :  { %1331 = vst [vmem:[#allocation2] sm:$0x3] %v1330_v20  ;;  %1336 = vst [vmem:[%s2203_s2] sm:$0x3] %v1330_v20 }

// kernel: graph_recur_net_gate_forward.5
= control target key start
LH: loop header
LB: loop body
LE: loop exit
PB: predicated region body
PF: predicated region fallthrough
CT: control target
= control target key end

     0   :  { %vm62_vm0 = vcmask 1043456   ;;  %vm58_vm1 = vcmask 31744   ;;  %v811_v1 = vmov 0.0   ;;  %vm812_vm2 = vmmov 0   ;;  %s1086_s0 = inlined_call_operand.vmem [shape: f32[2,32], index: 0, kind: input, shape index: {}]   ;;  %s1087_s1 = inlined_call_operand.vmem [shape: f32[2,4], index: 1, kind: input, shape index: {}]   ;;  %s1088_s2 = inlined_call_operand.vmem [shape: f32[4,32], index: 2, kind: input, shape index: {}]   ;;  %s1089_s3 = inlined_call_operand.vmem [shape: f32[1,32], index: 3, kind: input, shape index: {}]   ;;  %s1090_s4 = inlined_call_operand.vmem [shape: f32[32,32], index: 4, kind: input, shape index: {}]   ;;  %s1091_s5 = inlined_call_operand.vmem [shape: f32[1,32], index: 5, kind: input, shape index: {}]   ;;  %s1092_s6 = inlined_call_operand.vmem [shape: f32[32,32], index: 6, kind: input, shape index: {}]   ;;  %s1093_s7 = inlined_call_operand.vmem [shape: f32[1,32], index: 7, kind: input, shape index: {}]   ;;  %s1094_s8 = inlined_call_operand.vmem [shape: f32[32,128], index: 8, kind: input, shape index: {}]   ;;  %s1095_s9 = inlined_call_operand.vmem [shape: f32[1,128], index: 9, kind: input, shape index: {}]   ;;  %s1096_s10 = inlined_call_operand.vmem [shape: f32[128,64], index: 10, kind: input, shape index: {}]   ;;  %s1097_s11 = inlined_call_operand.vmem [shape: f32[1,64], index: 11, kind: input, shape index: {}]   ;;  %s1098_s12 = inlined_call_operand.vmem [shape: f32[64,4], index: 12, kind: input, shape index: {}]   ;;  %s1099_s13 = inlined_call_operand.vmem [shape: f32[1,4], index: 13, kind: input, shape index: {}]   ;;  %s1100_s14 = inlined_call_operand.hbm [shape: f32[2,4], index: 14, kind: output, shape index: {}]  }
   0x1   :  { %v50_v0 = vld [vmem:[%s1088_s2] sm:$0xf]  ;;  %680 = vmatprep.subr.mxu1 %v811_v1  ;;  %682 = vmatprep.mubr.msk.f32.mxu1 %vm812_vm2, %v811_v1 }
   0x2   :  { %v49_v2 = vld [vmem:[%s1087_s1] sm:$0x3] }
   0x3   :  { %19 = vsyncpa [#allocation3], 0  ;;  %681 = vmatpush3.msk.msra.mxu1 %vm62_vm0, %v50_v0  ;;  %696 = vmatprep.subr.mxu0 %v811_v1  ;;  %v144_v3 = vld [vmem:[%s1090_s4 + $0x18] sm:$0xff]  ;;  %v143_v4 = vld [vmem:[%s1090_s4 + $0x10] sm:$0xff]  ;;  %vm152_vm3 = vcmask 261120   ;;  %s813_s21 = smov 96  }
   0x4   :  { %683 = vmatmul.mubr.msk.f32.vlgmr.msra.gmra.mxu1 %vm58_vm1, %v49_v2  ;;  %685 = vmatprep.subr.mxu1 %v811_v1  ;;  %v142_v5 = vld [vmem:[%s1090_s4 + $0x8] sm:$0xff]  ;;  %v141_v6 = vld [vmem:[%s1090_s4] sm:$0xff]  ;;  %v323_v16 = vld [vmem:[%s1094_s8 + $0x18] sm:$0xff]  ;;  %s814_s25 = smov 32   ;;  %vm534_vm4 = vcmask 523264   ;;  %vm608_vm5 = vcmask 25600  }
   0x5   :  { %693 = vmatprep.mubr.msk.f32.mxu1 %vm812_vm2, %v811_v1  ;;  %704 = vmatprep.mubr.msk.f32.mxu0 %vm812_vm2, %v811_v1  ;;  %v624_v7 = vld [vmem:[%s1089_s3] ss:$0 sm:$0xff]  ;;  %v322_v17 = vld [vmem:[%s1094_s8 + $0x10] sm:$0xff]  ;;  %v321_v18 = vld [vmem:[%s1094_s8 + $0x8] sm:$0xff] }
   0x6   :  { %686 = vmatpush3.msra.mxu1 %v144_v3  ;;  %v320_v19 = vld [vmem:[%s1094_s8] sm:$0xff]  ;;  %v234_v21 = vld [vmem:[%s1092_s6 + $0x18] sm:$0xff]  ;;  %v233_v22 = vld [vmem:[%s1092_s6 + $0x10] sm:$0xff] }
   0x7   :  { %687 = vmatprep.subr.mxu1 %v811_v1  ;;  %v945_v20 = vld [vmem:[%s1086_s0] sm:$0x3]  ;;  %697 = vmatpush3.msra.mxu0 %v234_v21  ;;  %v232_v23 = vld [vmem:[%s1092_s6 + $0x8] sm:$0xff]  ;;  %v424_v36 = vld [vmem:[%s1096_s10 + $0x78] sm:$0xff] }
   0x8   :  { %688 = vmatpush3.msra.mxu1 %v143_v4  ;;  %698 = vmatprep.subr.mxu0 %v811_v1  ;;  %v231_v24 = vld [vmem:[%s1092_s6] sm:$0xff]  ;;  %v423_v38 = vld [vmem:[%s1096_s10 + $0x70] sm:$0xff]  ;;  %v422_v40 = vld [vmem:[%s1096_s10 + $0x68] sm:$0xff] }
   0x9   :  { %689 = vmatprep.subr.mxu1 %v811_v1  ;;  %699 = vmatpush3.msra.mxu0 %v233_v22  ;;  %v627_v25 = vld [vmem:[%s1091_s5] ss:$0 sm:$0xff]  ;;  %v420_v43 = vld [vmem:[%s1096_s10 + $0x58] sm:$0xff]  ;;  %v419_v44 = vld [vmem:[%s1096_s10 + $0x50] sm:$0xff] }
   0xa   :  { %690 = vmatpush3.msra.mxu1 %v142_v5  ;;  %700 = vmatprep.subr.mxu0 %v811_v1  ;;  %v631_v37 = vld [vmem:[%s1095_s9] ss:$0 sm:$0xff]  ;;  %v418_v45 = vld [vmem:[%s1096_s10 + $0x48] sm:$0xff]  ;;  %v416_v47 = vld [vmem:[%s1096_s10 + $0x38] sm:$0xff] }
   0xb   :  { %691 = vmatprep.subr.mxu1 %v811_v1  ;;  %701 = vmatpush3.msra.mxu0 %v232_v23  ;;  %v421_v41 = vld [vmem:[%s1096_s10 + $0x60] sm:$0xff]  ;;  %v415_v48 = vld [vmem:[%s1096_s10 + $0x30] sm:$0xff]  ;;  %v414_v49 = vld [vmem:[%s1096_s10 + $0x28] sm:$0xff] }
   0xc   :  { %692 = vmatpush3.msra.mxu1 %v141_v6  ;;  %702 = vmatprep.subr.mxu0 %v811_v1  ;;  %v417_v46 = vld [vmem:[%s1096_s10 + $0x40] sm:$0xff]  ;;  %v412_v51 = vld [vmem:[%s1096_s10 + $0x18] sm:$0xff]  ;;  %v411_v53 = vld [vmem:[%s1096_s10 + $0x10] sm:$0xff] }
   0xd   :  { %707 = vmatprep.subr.mxu1 %v811_v1  ;;  %703 = vmatpush3.msra.mxu0 %v231_v24  ;;  %v413_v50 = vld [vmem:[%s1096_s10 + $0x20] sm:$0xff]  ;;  %v410_v56 = vld [vmem:[%s1096_s10 + $0x8] sm:$0xff]  ;;  %v526_v5 = vld [vmem:[%s1098_s12 + $0x38] sm:$0xff] }
   0xe   :  { %718 = vmatprep.subr.mxu0 %v811_v1  ;;  %v409_v57 = vld [vmem:[%s1096_s10] sm:$0xff]  ;;  %v525_v6 = vld [vmem:[%s1098_s12 + $0x30] sm:$0xff] }
   0xf   :  { %v633_v61 = vld [vmem:[%s1097_s11] ss:$0 sm:$0xff] }
  0xc4   :  { %v132_v8 = vpop.f32.mrf.mxu1 }
  0xc5   :  { %v133_v9 = vadd.f32 %v624_v7, %v132_v8  ;;  %v524_v7 = vld [vmem:[%s1098_s12 + $0x28] sm:$0xff]  ;;  %v523_v8 = vld [vmem:[%s1098_s12 + $0x20] sm:$0xff] }
  0xc6   :  { %v684_v10 = vpop.f32.mrf.mxu1 }
  0xc7   :  { %v137_v11 = vmul.f32 0.70710677, %v133_v9  ;;  %v136_v13 = vmul.f32 0.5, %v133_v9  ;;  %v522_v9 = vld [vmem:[%s1098_s12 + $0x18] sm:$0xff]  ;;  %v521_v10 = vld [vmem:[%s1098_s12 + $0x10] sm:$0xff] }
  0xc9   :  { %777 = verf.f32 %v137_v11 }
  0xd6   :  { %v778_v12 = vpop.eup %777 }
  0xd7   :  { %v139_v14 = vadd.f32 1.0, %v778_v12  ;;  %v520_v12 = vld [vmem:[%s1098_s12 + $0x8] sm:$0xff] }
  0xd9   :  { %v140_v15 = vmul.f32 %v139_v14, %v136_v13  ;;  %v629_v13 = vld [vmem:[%s1093_s7] ss:$0 sm:$0xff] }
  0xdb   :  { %694 = vmatmul.mubr.msk.f32.vlgmr.msra.gmra.mxu1 %vm152_vm3, %v140_v15 }
  0xdc   :  { %708 = vmatpush3.msra.mxu1 %v323_v16  ;;  %715 = vmatprep.mubr.msk.f32.mxu1 %vm812_vm2, %v811_v1  ;;  %v519_v16 = vld [vmem:[%s1098_s12] sm:$0xff]  ;;  %s815_s12 = smov [#allocation2]  }
  0xdd   :  { %709 = vmatprep.subr.mxu1 %v811_v1  ;;  %s616_s26 = sshll.u32 %s815_s12, 4  ;;  %s617_s26 = int_to_ptr.vmem [resolvable:$true] %s616_s26 }
  0xde   :  { %710 = vmatpush3.msra.mxu1 %v322_v17  ;;  %s789_s4 = scalar_lea.vmem %s617_s26, 32  ;;  %p794_p1 = scmp.lt.s32.totalorder %s617_s26, %s617_s26 }
  0xdf   :  { %711 = vmatprep.subr.mxu1 %v811_v1  ;;  %p790_p0 = scmp.ne.s32.totalorder %s617_s26, %s789_s4  ;;  %p795_p2 = scmp.lt.s32.totalorder %s789_s4, %s789_s4 }
  0xe0   :  { %712 = vmatpush3.msra.mxu1 %v321_v18 }
  0xe1   :  { %713 = vmatprep.subr.mxu1 %v811_v1  ;;  %p796_p3 = por %p795_p2, %p794_p1 }
  0xe2   :  { %714 = vmatpush3.msra.mxu1 %v320_v19 }
  0xe3   :  { %716 = vmatmul.mubr.msk.f32.vlgmr.msra.gmra.mxu1 %vm152_vm3, %v945_v20  ;;  %753 = vmatprep.subr.mxu1 %v811_v1  ;;  %p797_p4 = pnand %p796_p3, %p790_p0 }
  0xe4   :  { %769 = vmatprep.mubr.msk.f32.mxu1 %vm812_vm2, %v811_v1  ;;  %754 = vmatpush3.msra.mxu1 %v526_v5 }
  0xe5   :  { %755 = vmatprep.subr.mxu1 %v811_v1 }
  0xe6   :  { %756 = vmatpush3.msra.mxu1 %v525_v6 }
  0xe7   :  { %757 = vmatprep.subr.mxu1 %v811_v1 }
  0xe8   :  { %758 = vmatpush3.msra.mxu1 %v524_v7 }
  0xe9   :  { %759 = vmatprep.subr.mxu1 %v811_v1 }
  0xea   :  { %760 = vmatpush3.msra.mxu1 %v523_v8 }
  0xeb   :  { %761 = vmatprep.subr.mxu1 %v811_v1 }
  0xec   :  { %762 = vmatpush3.msra.mxu1 %v522_v9 }
  0xed   :  { %763 = vmatprep.subr.mxu1 %v811_v1 }
  0xee   :  { %764 = vmatpush3.msra.mxu1 %v521_v10 }
  0xef   :  { %765 = vmatprep.subr.mxu1 %v811_v1 }
  0xf0   :  { %766 = vmatpush3.msra.mxu1 %v520_v12 }
  0xf1   :  { %767 = vmatprep.subr.mxu1 %v811_v1 }
  0xf2   :  { %768 = vmatpush3.msra.mxu1 %v519_v16 }
 0x19b   :  { %v222_v26 = vpop.f32.mrf.mxu1 }
 0x19c   :  { %v223_v27 = vadd.f32 %v627_v25, %v222_v26  ;;  %v635_v26 = vld [vmem:[%s1099_s13] ss:$0 sm:$0xff] }
 0x19d   :  { %v695_v28 = vpop.f32.mrf.mxu1 }
 0x19e   :  { %v227_v29 = vmul.f32 0.70710677, %v223_v27  ;;  %v226_v33 = vmul.f32 0.5, %v223_v27 }
 0x1a0   :  { %779 = verf.f32 %v227_v29 }
 0x1a3   :  { %v400_v30 = vpop.f32.mrf.mxu1 }
 0x1a4   :  { %v401_v39 = vadd.f32 %v631_v37, %v400_v30 }
 0x1a5   :  { %v717_v31 = vpop.f32.mrf.mxu1 }
 0x1a6   :  { %v405_v42 = vmul.f32 0.70710677, %v401_v39  ;;  %v404_v54 = vmul.f32 0.5, %v401_v39 }
 0x1a8   :  { %781 = verf.f32 %v405_v42 }
 0x1ad   :  { %v780_v32 = vpop.eup %779 }
 0x1ae   :  { %v229_v34 = vadd.f32 1.0, %v780_v32 }
 0x1b0   :  { %v230_v35 = vmul.f32 %v229_v34, %v226_v33 }
 0x1b2   :  { %705 = vmatmul.mubr.msk.f32.vlgmr.msra.gmra.mxu0 %vm152_vm3, %v230_v35 }
 0x1b3   :  { %719 = vmatpush3.msra.mxu0 %v424_v36  ;;  %750 = vmatprep.mubr.msk.f32.mxu0 %vm812_vm2, %v811_v1 }
 0x1b4   :  { %720 = vmatprep.subr.mxu0 %v811_v1 }
 0x1b5   :  { %721 = vmatpush3.msra.mxu0 %v423_v38  ;;  %v782_v52 = vpop.eup %781 }
 0x1b6   :  { %722 = vmatprep.subr.mxu0 %v811_v1  ;;  %v407_v55 = vadd.f32 1.0, %v782_v52 }
 0x1b7   :  { %723 = vmatpush3.msra.mxu0 %v422_v40 }
 0x1b8   :  { %724 = vmatprep.subr.mxu0 %v811_v1  ;;  %v408_v58 = vmul.f32 %v407_v55, %v404_v54 }
 0x1b9   :  { %725 = vmatpush3.msra.mxu0 %v421_v41 }
 0x1ba   :  { %726 = vmatprep.subr.mxu0 %v811_v1 }
 0x1bb   :  { %727 = vmatpush3.msra.mxu0 %v420_v43 }
 0x1bc   :  { %728 = vmatprep.subr.mxu0 %v811_v1 }
 0x1bd   :  { %729 = vmatpush3.msra.mxu0 %v419_v44 }
 0x1be   :  { %730 = vmatprep.subr.mxu0 %v811_v1 }
 0x1bf   :  { %731 = vmatpush3.msra.mxu0 %v418_v45 }
 0x1c0   :  { %732 = vmatprep.subr.mxu0 %v811_v1 }
 0x1c1   :  { %733 = vmatpush3.msra.mxu0 %v417_v46 }
 0x1c2   :  { %734 = vmatprep.subr.mxu0 %v811_v1 }
 0x1c3   :  { %735 = vmatpush3.msra.mxu0 %v416_v47 }
 0x1c4   :  { %736 = vmatprep.subr.mxu0 %v811_v1 }
 0x1c5   :  { %737 = vmatpush3.msra.mxu0 %v415_v48 }
 0x1c6   :  { %738 = vmatprep.subr.mxu0 %v811_v1 }
 0x1c7   :  { %739 = vmatpush3.msra.mxu0 %v414_v49 }
 0x1c8   :  { %740 = vmatprep.subr.mxu0 %v811_v1 }
 0x1c9   :  { %741 = vmatpush3.msra.mxu0 %v413_v50 }
 0x1ca   :  { %742 = vmatprep.subr.mxu0 %v811_v1 }
 0x1cb   :  { %743 = vmatpush3.msra.mxu0 %v412_v51 }
 0x1cc   :  { %744 = vmatprep.subr.mxu0 %v811_v1 }
 0x1cd   :  { %745 = vmatpush3.msra.mxu0 %v411_v53 }
 0x1ce   :  { %746 = vmatprep.subr.mxu0 %v811_v1 }
 0x1cf   :  { %747 = vmatpush3.msra.mxu0 %v410_v56 }
 0x1d0   :  { %748 = vmatprep.subr.mxu0 %v811_v1 }
 0x1d1   :  { %749 = vmatpush3.msra.mxu0 %v409_v57 }
 0x1d2   :  { %751 = vmatmul.mubr.f32.vlgmr.msra.gmra.mxu0 %v408_v58 }
 0x272   :  { %v311_v59 = vpop.f32.mrf.mxu0 }
 0x273   :  { %v312_v14 = vadd.f32 %v629_v13, %v311_v59 }
 0x274   :  { %v706_v60 = vpop.f32.mrf.mxu0 }
 0x275   :  { %v316_v15 = vmul.f32 0.70710677, %v312_v14  ;;  %v315_v19 = vmul.f32 0.5, %v312_v14 }
 0x292   :  { %v498_v62 = vpop.f32.mrf.mxu0 }
 0x293   :  { %v499_v63 = vadd.f32 %v633_v61, %v498_v62 }
 0x294   :  { %v752_v0 = vpop.f32.mrf.mxu0 }
 0x295   :  { %v634_v2 = vmul.f32 -1.442695, %v499_v63 }
 0x297   :  { %783 = vpow2.f32 %v634_v2 }
 0x2a4   :  { %v784_v3 = vpop.eup %783 }
 0x2a5   :  { %v505_v4 = vadd.f32 1.0, %v784_v3 }
 0x2a7   :  { %785 = vrcp.f32 %v505_v4 }
 0x2a8   :  { %787 = verf.f32 %v316_v15 }
 0x2b4   :  { %v786_v11 = vpop.eup %785 }
 0x2b5   :  { %510 = vrot.lane.b32.xlu0 %v786_v11, %s813_s21  ;;  %v788_v17 = vpop.eup %787  ;;  %v508_v1 = vmul.f32 %v786_v11, %v945_v20 }
 0x2b6   :  { %v318_v18 = vadd.f32 1.0, %v788_v17 }
 0x2b8   :  { %v319_v21 = vmul.f32 %v318_v18, %v315_v19 }
 0x327   :  { %v511_v22 = vpop.permute.xlu0 %510 }
 0x328   :  { %v513_v23 = vmul.f32 %v511_v22, %v319_v21 }
 0x32a   :  { %515 = vrot.lane.b32.xlu0 %v513_v23, %s814_s25 }
 0x39c   :  { %v516_v24 = vpop.permute.xlu0 %515 }
 0x39d   :  { %v518_v25 = vsel %vm152_vm3, %v508_v1, %v516_v24 }
 0x39e   :  { %770 = vmatmul.mubr.msk.f32.vlgmr.msra.gmra.mxu1 %vm534_vm4, %v518_v25 }
 0x45e   :  { %v604_v27 = vpop.f32.mrf.mxu1 }
 0x45f   :  { %v605_v28 = vadd.f32 %v635_v26, %v604_v27 }
 0x460   :  { %v771_v29 = vpop.f32.mrf.mxu1 }
 0x461   :  { %609 = vst.msk [vmem:[#allocation2] sm:$0x3] %vm608_vm5, %v605_v28 }
 0x462   :  { %800 = shalt.err (!%p797_p4)
}
 0x463   :  { %619 = dma.vmem_to_hbm [thread:$0]  %s617_s26, 32, %s1100_s14, [#allocation3]  }
 0x464   :  { %809 = dma.done.wait [#allocation3], 32  }
 0x465   :  { %810 = vsyncadd [#allocation3], 4294967264 }
 0x466   :  { %623 = vsyncpa [#allocation3], 1 }

</bundles_post_ra>
